<compile_context>
chip_gen: v7x
topology: tpu7x:2x2x1
jax: 0.10.0
libtpu: 0.0.40
codegen_flags: <defaults>
</compile_context>

<pallas_src>
import math
import numpy as np
import jax
import jax.numpy as jnp
from jax.experimental import pallas as pl
from jax.experimental.pallas import tpu as pltpu


# ---------------------------------------------------------------------------
# Resize matrices (built once, on host, in numpy; W matrices pre-transposed).
# ---------------------------------------------------------------------------
def _area_matrix(out_size, in_size):
    """F.interpolate(mode='area') with an integer factor == block averaging."""
    # TODO(synk): non-integer area scale factors are not supported here.
    assert in_size % out_size == 0, "area resize assumes an integer factor"
    f = in_size // out_size
    m = np.zeros((out_size, in_size), np.float32)
    for i in range(out_size):
        m[i, i * f:(i + 1) * f] = 1.0 / f
    return m


def _bilinear_matrix(out_size, in_size):
    """F.interpolate(mode='bilinear', align_corners=False) as a 1-D matrix."""
    m = np.zeros((out_size, in_size), np.float32)
    scale = in_size / out_size
    for i in range(out_size):
        src = max((i + 0.5) * scale - 0.5, 0.0)
        i0 = min(int(np.floor(src)), in_size - 1)
        i1 = min(i0 + 1, in_size - 1)
        frac = src - i0
        m[i, i0] += 1.0 - frac
        m[i, i1] += frac
    return m


def _lcm(a, b):
    return a * b // math.gcd(a, b)


def _choose_tile_h(H, area_factors, target=256):
    """Largest H-tile that (a) divides H, (b) keeps each per-level row tile a
    multiple of 8 sublanes, and (c) stays <= `target` rows (VMEM budget)."""
    base = 8
    for f in area_factors:
        base = _lcm(base, 8 * f)
    if base > H or H % base != 0:
        return H                     # fall back: a single tile over the full height
    th = base
    while th * 2 <= min(H, target) and H % (th * 2) == 0:
        th *= 2
    return th


# ---------------------------------------------------------------------------
# Fused kernel.
# ---------------------------------------------------------------------------
def _build_kernel(C, level_meta, r_meta):
    """level_meta: list of (th_i, w_i, coef_i). r_meta: (h0, w0, coef_r) or None.

    Ref order: gt, [x_i, areaH_i, areaWT_i]*, (x0, mh_tile, mwT_r)?, out.
    Per grid step the kernel emits one (8,128) tile with the weighted/normalized
    MS partial sum in row 0 and the real-EPE partial sum in row 1.
    """

    def kernel(*refs):
        gt_ref = refs[0]
        pos = 1

        # -------- multiscale branch: area-downsample gt tile, EPE per level --
        ms_total = jnp.float32(0.0)
        for (th, w, coef) in level_meta:
            x_ref, ah_ref, awt_ref = refs[pos], refs[pos + 1], refs[pos + 2]
            pos += 3
            ah = ah_ref[...]                       # (th, TH)  area-H block matrix
            awt = awt_ref[...]                     # (W,  w)   area-W (transposed)
            sq = None
            for c in range(C):                     # C == 2 flow channels
                gc = gt_ref[0, c].astype(jnp.float32)                       # (TH, W)
                gw = jnp.dot(gc, awt, preferred_element_type=jnp.float32)   # (TH, w)
                gd = jnp.dot(ah, gw, preferred_element_type=jnp.float32)    # (th, w)
                dc = x_ref[0, c].astype(jnp.float32) - gd
                sq = dc * dc if sq is None else sq + dc * dc
            ms_total = ms_total + jnp.float32(coef) * jnp.sum(jnp.sqrt(sq))

        # -------- real-EPE branch: bilinear-upsample finest pred to gt tile --
        r_total = jnp.float32(0.0)
        if r_meta is not None:
            _, _, rcoef = r_meta
            x0_ref, mh_ref, mwt_ref = refs[pos], refs[pos + 1], refs[pos + 2]
            pos += 3
            mh = mh_ref[...]                       # (TH, h0)  bilinear-H rows of tile
            mwt = mwt_ref[...]                     # (w0, W)   bilinear-W (transposed)
            sq = None
            for c in range(C):
                xc = x0_ref[0, c].astype(jnp.float32)                        # (h0, w0)
                t1 = jnp.dot(mh, xc, preferred_element_type=jnp.float32)     # (TH, w0)
                up = jnp.dot(t1, mwt, preferred_element_type=jnp.float32)    # (TH, W)
                dc = gt_ref[0, c].astype(jnp.float32) - up
                sq = dc * dc if sq is None else sq + dc * dc
            r_total = jnp.float32(rcoef) * jnp.sum(jnp.sqrt(sq))

        out_ref = refs[pos]
        rows = jax.lax.broadcasted_iota(jnp.int32, (8, 128), 0)
        out_ref[0, 0] = (jnp.where(rows == 0, ms_total, 0.0)
                         + jnp.where(rows == 1, r_total, 0.0)).astype(jnp.float32)

    return kernel


def _fused_epe_losses(gt, flows, weights, has_ms, has_r, tile_h_target=256):
    B, C, H, W = gt.shape
    ms_levels = list(flows) if has_ms else []

    factors = []
    for x in ms_levels:
        _, _, h, w = x.shape
        assert H % h == 0 and W % w == 0            # integer area factors only
        factors.append(H // h)
    TH = _choose_tile_h(H, factors, tile_h_target)
    NH = H // TH

    inputs = [gt]
    in_specs = [pl.BlockSpec((1, C, TH, W), lambda b, t: (b, 0, t, 0))]

    level_meta = []
    for x, wgt in zip(ms_levels, weights):
        _, _, h, w = x.shape
        fh = H // h
        th = TH // fh
        inputs.append(x)
        in_specs.append(pl.BlockSpec((1, C, th, w), lambda b, t: (b, 0, t, 0)))
        # Area-H restricted to one tile is the same (th, TH) block for every t.
        inputs.append(jnp.asarray(_area_matrix(th, TH)))
        in_specs.append(pl.BlockSpec((th, TH), lambda b, t: (0, 0)))
        inputs.append(jnp.asarray(np.ascontiguousarray(_area_matrix(w, W).T)))
        in_specs.append(pl.BlockSpec((W, w), lambda b, t: (0, 0)))
        level_meta.append((th, w, float(wgt) / float(B * h * w)))

    r_meta = None
    if has_r:
        x0 = flows[0]
        _, _, h0, w0 = x0.shape
        inputs.append(x0)                                             # full per batch
        in_specs.append(pl.BlockSpec((1, C, h0, w0), lambda b, t: (b, 0, 0, 0)))
        inputs.append(jnp.asarray(_bilinear_matrix(H, h0)))           # (H, h0), row-tiled
        in_specs.append(pl.BlockSpec((TH, h0), lambda b, t: (t, 0)))
        inputs.append(jnp.asarray(np.ascontiguousarray(_bilinear_matrix(W, w0).T)))
        in_specs.append(pl.BlockSpec((w0, W), lambda b, t: (0, 0)))
        r_meta = (h0, w0, 1.0 / float(B * H * W))

    kernel = _build_kernel(C, level_meta, r_meta)

    out = pl.pallas_call(
        kernel,
        out_shape=jax.ShapeDtypeStruct((B, NH, 8, 128), jnp.float32),
        grid_spec=pltpu.PrefetchScalarGridSpec(
            num_scalar_prefetch=0,
            grid=(B, NH),
            in_specs=in_specs,
            out_specs=pl.BlockSpec((1, 1, 8, 128), lambda b, t: (b, t, 0, 0)),
        ),
        compiler_params=pltpu.CompilerParams(
            dimension_semantics=("parallel", "parallel")),
    )(*inputs)

    ms = jnp.sum(out[:, :, 0, 0]) if has_ms else None
    r = jnp.sum(out[:, :, 1, 0]) if has_r else None
    return ms, r


class EPELossPallas:
    """JAX/Pallas re-implementation of the PyTorch EPELoss forward pass
    (dense, mean=True configuration)."""

    def __init__(self, sparse=False, mean=True, weights=None,
                 loss_labels=("MS", "R"), tile_h=256):
        # TODO(synk): sparse=True (sparse_max_pool + mask filtering of the EPE
        # map) and mean=False (per-pixel map / batch-normalized output) paths
        # are not implemented; only the dense-mean configuration is supported.
        assert not sparse and mean
        self.sparse = sparse
        self.mean = mean
        self.weights = weights
        self.loss_labels = loss_labels
        self.tile_h = tile_h

    def __call__(self, preds, gts):
        flows = preds["flow"]
        if not isinstance(flows, (tuple, list)):
            flows = [flows]
        has_ms = "MS" in self.loss_labels
        has_r = "R" in self.loss_labels
        weights = self.weights
        if weights is None:
            weights = [0.005, 0.01, 0.02, 0.08, 0.32]
        if has_ms:
            assert len(weights) == len(flows)
        ms, r = _fused_epe_losses(gts, flows, weights, has_ms, has_r, self.tile_h)
        losses = {}
        if has_ms:
            losses["MS"] = ms
        if has_r:
            losses["R"] = r
        return losses


# ---------------------------------------------------------------------------
# Pure-JAX reference (same resize matrices, torch semantics) + self-test.
# ---------------------------------------------------------------------------
def _resize_ref(src, mh, mw):
    r = jnp.einsum("oh,bchw->bcow", mh, src.astype(jnp.float32),
                   precision=jax.lax.Precision.HIGHEST)
    r = jnp.einsum("bchw,ow->bcho", r, mw,
                   precision=jax.lax.Precision.HIGHEST)
    return r


def _epe_mean_ref(x, y):
    d = y.astype(jnp.float32) - x.astype(jnp.float32)
    return jnp.mean(jnp.sqrt(jnp.sum(d * d, axis=1)))


if __name__ == "__main__":
    key = jax.random.PRNGKey(0)
    k1, k2, k3 = jax.random.split(key, 3)

    # gt optical flow and two pyramid-level predictions (flownet style).
    gt = jax.random.normal(k1, (2, 2, 64, 64), jnp.float32)
    flows = [
        jax.random.normal(k2, (2, 2, 32, 32), jnp.float32),
        jax.random.normal(k3, (2, 2, 16, 16), jnp.float32),
    ]
    weights = [0.005, 0.01]

    # tile_h=32 -> grid (B=2, NH=2): exercises both grid axes.
    loss_fn = EPELossPallas(sparse=False, mean=True, weights=weights,
                            loss_labels=("MS", "R"), tile_h=32)
    losses = loss_fn({"flow": flows}, gt)
    losses = jax.block_until_ready(losses)

    # Reference values.
    B, _, H, W = gt.shape
    ms_ref = jnp.float32(0.0)
    for x, wgt in zip(flows, weights):
        _, _, h, w = x.shape
        y_s = _resize_ref(gt, jnp.asarray(_area_matrix(h, H)),
                          jnp.asarray(_area_matrix(w, W)))
        ms_ref = ms_ref + wgt * _epe_mean_ref(x, y_s)
    _, _, h0, w0 = flows[0].shape
    up = _resize_ref(flows[0], jnp.asarray(_bilinear_matrix(H, h0)),
                     jnp.asarray(_bilinear_matrix(W, w0)))
    r_ref = _epe_mean_ref(up, gt)

    np.testing.assert_allclose(np.asarray(losses["MS"]), np.asarray(ms_ref),
                               rtol=5e-5, atol=1e-5)
    np.testing.assert_allclose(np.asarray(losses["R"]), np.asarray(r_ref),
                               rtol=5e-5, atol=1e-5)

    print("KERNEL_OK")
</pallas_src>

<mosaic_0001>
module attributes {stable_mosaic.version = 11 : i64} {
  func.func @kernel(%arg0: i32, %arg1: i32, %arg2: memref<1x2x32x64xf32, #tpu.memory_space<vmem>>, %arg3: memref<1x2x16x32xf32, #tpu.memory_space<vmem>>, %arg4: memref<16x32xf32, #tpu.memory_space<vmem>>, %arg5: memref<64x32xf32, #tpu.memory_space<vmem>>, %arg6: memref<1x2x8x16xf32, #tpu.memory_space<vmem>>, %arg7: memref<8x32xf32, #tpu.memory_space<vmem>>, %arg8: memref<64x16xf32, #tpu.memory_space<vmem>>, %arg9: memref<1x2x32x32xf32, #tpu.memory_space<vmem>>, %arg10: memref<32x32xf32, #tpu.memory_space<vmem>>, %arg11: memref<32x64xf32, #tpu.memory_space<vmem>>, %arg12: memref<1x1x8x128xf32, #tpu.memory_space<vmem>>) attributes {dimension_semantics = [#tpu.dimension_semantics<parallel>, #tpu.dimension_semantics<parallel>], iteration_bounds = array<i64: 2, 2>, scalar_prefetch = 0 : i64, scratch_operands = 0 : i64, tpu.core_type = #tpu.core_type<tc>, window_params = [{transform_indices = @transform_0, window_bounds = array<i64: 1, 2, 32, 64>}, {transform_indices = @transform_1, window_bounds = array<i64: 1, 2, 16, 32>}, {pipeline_mode = #tpu.pipeline_mode<synchronous>, transform_indices = @transform_2, window_bounds = array<i64: 16, 32>}, {pipeline_mode = #tpu.pipeline_mode<synchronous>, transform_indices = @transform_3, window_bounds = array<i64: 64, 32>}, {transform_indices = @transform_4, window_bounds = array<i64: 1, 2, 8, 16>}, {pipeline_mode = #tpu.pipeline_mode<synchronous>, transform_indices = @transform_5, window_bounds = array<i64: 8, 32>}, {pipeline_mode = #tpu.pipeline_mode<synchronous>, transform_indices = @transform_6, window_bounds = array<i64: 64, 16>}, {transform_indices = @transform_7, window_bounds = array<i64: 1, 2, 32, 32>}, {transform_indices = @transform_8, window_bounds = array<i64: 32, 32>}, {pipeline_mode = #tpu.pipeline_mode<synchronous>, transform_indices = @transform_9, window_bounds = array<i64: 32, 64>}, {transform_indices = @transform_10, window_bounds = array<i64: 1, 1, 8, 128>}]} {
    %c0 = arith.constant 0 : index
    %c0_0 = arith.constant 0 : index
    %0 = vector.load %arg4[%c0, %c0_0] : memref<16x32xf32, #tpu.memory_space<vmem>>, vector<16x32xf32>
    %c0_1 = arith.constant 0 : index
    %c0_2 = arith.constant 0 : index
    %1 = vector.load %arg5[%c0_1, %c0_2] : memref<64x32xf32, #tpu.memory_space<vmem>>, vector<64x32xf32>
    %c0_3 = arith.constant 0 : index
    %c0_4 = arith.constant 0 : index
    %c0_5 = arith.constant 0 : index
    %c0_6 = arith.constant 0 : index
    %2 = vector.load %arg2[%c0_3, %c0_4, %c0_5, %c0_6] : memref<1x2x32x64xf32, #tpu.memory_space<vmem>>, vector<1x1x32x64xf32>
    %3 = vector.shape_cast %2 : vector<1x1x32x64xf32> to vector<32x64xf32>
    %cst = arith.constant dense<0.000000e+00> : vector<32x32xf32>
    %4 = tpu.matmul %3, %1, %cst {dimension_numbers = #tpu.dot_dimension_numbers<[1], [0], [0], [1], [0, 0, 1, 1], [], []>} : vector<32x64xf32>, vector<64x32xf32>, vector<32x32xf32> -> vector<32x32xf32>
    %cst_7 = arith.constant dense<0.000000e+00> : vector<16x32xf32>
    %5 = tpu.matmul %0, %4, %cst_7 {dimension_numbers = #tpu.dot_dimension_numbers<[1], [0], [0], [1], [0, 0, 1, 1], [], []>} : vector<16x32xf32>, vector<32x32xf32>, vector<16x32xf32> -> vector<16x32xf32>
    %c0_8 = arith.constant 0 : index
    %c0_9 = arith.constant 0 : index
    %c0_10 = arith.constant 0 : index
    %c0_11 = arith.constant 0 : index
    %6 = vector.load %arg3[%c0_8, %c0_9, %c0_10, %c0_11] : memref<1x2x16x32xf32, #tpu.memory_space<vmem>>, vector<1x1x16x32xf32>
    %7 = vector.shape_cast %6 : vector<1x1x16x32xf32> to vector<16x32xf32>
    %8 = arith.subf %7, %5 : vector<16x32xf32>
    %9 = arith.mulf %8, %8 : vector<16x32xf32>
    %c0_12 = arith.constant 0 : index
    %c1 = arith.constant 1 : index
    %c0_13 = arith.constant 0 : index
    %c0_14 = arith.constant 0 : index
    %10 = vector.load %arg2[%c0_12, %c1, %c0_13, %c0_14] : memref<1x2x32x64xf32, #tpu.memory_space<vmem>>, vector<1x1x32x64xf32>
    %11 = vector.shape_cast %10 : vector<1x1x32x64xf32> to vector<32x64xf32>
    %cst_15 = arith.constant dense<0.000000e+00> : vector<32x32xf32>
    %12 = tpu.matmul %11, %1, %cst_15 {dimension_numbers = #tpu.dot_dimension_numbers<[1], [0], [0], [1], [0, 0, 1, 1], [], []>} : vector<32x64xf32>, vector<64x32xf32>, vector<32x32xf32> -> vector<32x32xf32>
    %cst_16 = arith.constant dense<0.000000e+00> : vector<16x32xf32>
    %13 = tpu.matmul %0, %12, %cst_16 {dimension_numbers = #tpu.dot_dimension_numbers<[1], [0], [0], [1], [0, 0, 1, 1], [], []>} : vector<16x32xf32>, vector<32x32xf32>, vector<16x32xf32> -> vector<16x32xf32>
    %c0_17 = arith.constant 0 : index
    %c1_18 = arith.constant 1 : index
    %c0_19 = arith.constant 0 : index
    %c0_20 = arith.constant 0 : index
    %14 = vector.load %arg3[%c0_17, %c1_18, %c0_19, %c0_20] : memref<1x2x16x32xf32, #tpu.memory_space<vmem>>, vector<1x1x16x32xf32>
    %15 = vector.shape_cast %14 : vector<1x1x16x32xf32> to vector<16x32xf32>
    %16 = arith.subf %15, %13 : vector<16x32xf32>
    %17 = arith.mulf %16, %16 : vector<16x32xf32>
    %18 = arith.addf %9, %17 : vector<16x32xf32>
    %19 = math.sqrt %18 : vector<16x32xf32>
    %20 = vector.shape_cast %19 : vector<16x32xf32> to vector<1x16x32xf32>
    %cst_21 = arith.constant dense<0.000000e+00> : vector<1xf32>
    %21 = vector.multi_reduction <add>, %20, %cst_21 [1, 2] : vector<1x16x32xf32> to vector<1xf32>
    %22 = vector.shape_cast %21 : vector<1xf32> to vector<1x1x1xf32>
    %23 = vector.extract %22[0, 0, 0] : f32 from vector<1x1x1xf32>
    %cst_22 = arith.constant 2.4414062E-6 : f32
    %24 = arith.mulf %cst_22, %23 : f32
    %cst_23 = arith.constant 0.000000e+00 : f32
    %25 = arith.addf %cst_23, %24 : f32
    %c0_24 = arith.constant 0 : index
    %c0_25 = arith.constant 0 : index
    %26 = vector.load %arg7[%c0_24, %c0_25] : memref<8x32xf32, #tpu.memory_space<vmem>>, vector<8x32xf32>
    %c0_26 = arith.constant 0 : index
    %c0_27 = arith.constant 0 : index
    %27 = vector.load %arg8[%c0_26, %c0_27] : memref<64x16xf32, #tpu.memory_space<vmem>>, vector<64x16xf32>
    %c0_28 = arith.constant 0 : index
    %c0_29 = arith.constant 0 : index
    %c0_30 = arith.constant 0 : index
    %c0_31 = arith.constant 0 : index
    %28 = vector.load %arg2[%c0_28, %c0_29, %c0_30, %c0_31] : memref<1x2x32x64xf32, #tpu.memory_space<vmem>>, vector<1x1x32x64xf32>
    %29 = vector.shape_cast %28 : vector<1x1x32x64xf32> to vector<32x64xf32>
    %cst_32 = arith.constant dense<0.000000e+00> : vector<32x16xf32>
    %30 = tpu.matmul %29, %27, %cst_32 {dimension_numbers = #tpu.dot_dimension_numbers<[1], [0], [0], [1], [0, 0, 1, 1], [], []>} : vector<32x64xf32>, vector<64x16xf32>, vector<32x16xf32> -> vector<32x16xf32>
    %cst_33 = arith.constant dense<0.000000e+00> : vector<8x16xf32>
    %31 = tpu.matmul %26, %30, %cst_33 {dimension_numbers = #tpu.dot_dimension_numbers<[1], [0], [0], [1], [0, 0, 1, 1], [], []>} : vector<8x32xf32>, vector<32x16xf32>, vector<8x16xf32> -> vector<8x16xf32>
    %c0_34 = arith.constant 0 : index
    %c0_35 = arith.constant 0 : index
    %c0_36 = arith.constant 0 : index
    %c0_37 = arith.constant 0 : index
    %32 = vector.load %arg6[%c0_34, %c0_35, %c0_36, %c0_37] : memref<1x2x8x16xf32, #tpu.memory_space<vmem>>, vector<1x1x8x16xf32>
    %33 = vector.shape_cast %32 : vector<1x1x8x16xf32> to vector<8x16xf32>
    %34 = arith.subf %33, %31 : vector<8x16xf32>
    %35 = arith.mulf %34, %34 : vector<8x16xf32>
    %c0_38 = arith.constant 0 : index
    %c1_39 = arith.constant 1 : index
    %c0_40 = arith.constant 0 : index
    %c0_41 = arith.constant 0 : index
    %36 = vector.load %arg2[%c0_38, %c1_39, %c0_40, %c0_41] : memref<1x2x32x64xf32, #tpu.memory_space<vmem>>, vector<1x1x32x64xf32>
    %37 = vector.shape_cast %36 : vector<1x1x32x64xf32> to vector<32x64xf32>
    %cst_42 = arith.constant dense<0.000000e+00> : vector<32x16xf32>
    %38 = tpu.matmul %37, %27, %cst_42 {dimension_numbers = #tpu.dot_dimension_numbers<[1], [0], [0], [1], [0, 0, 1, 1], [], []>} : vector<32x64xf32>, vector<64x16xf32>, vector<32x16xf32> -> vector<32x16xf32>
    %cst_43 = arith.constant dense<0.000000e+00> : vector<8x16xf32>
    %39 = tpu.matmul %26, %38, %cst_43 {dimension_numbers = #tpu.dot_dimension_numbers<[1], [0], [0], [1], [0, 0, 1, 1], [], []>} : vector<8x32xf32>, vector<32x16xf32>, vector<8x16xf32> -> vector<8x16xf32>
    %c0_44 = arith.constant 0 : index
    %c1_45 = arith.constant 1 : index
    %c0_46 = arith.constant 0 : index
    %c0_47 = arith.constant 0 : index
    %40 = vector.load %arg6[%c0_44, %c1_45, %c0_46, %c0_47] : memref<1x2x8x16xf32, #tpu.memory_space<vmem>>, vector<1x1x8x16xf32>
    %41 = vector.shape_cast %40 : vector<1x1x8x16xf32> to vector<8x16xf32>
    %42 = arith.subf %41, %39 : vector<8x16xf32>
    %43 = arith.mulf %42, %42 : vector<8x16xf32>
    %44 = arith.addf %35, %43 : vector<8x16xf32>
    %45 = math.sqrt %44 : vector<8x16xf32>
    %46 = vector.shape_cast %45 : vector<8x16xf32> to vector<1x8x16xf32>
    %cst_48 = arith.constant dense<0.000000e+00> : vector<1xf32>
    %47 = vector.multi_reduction <add>, %46, %cst_48 [1, 2] : vector<1x8x16xf32> to vector<1xf32>
    %48 = vector.shape_cast %47 : vector<1xf32> to vector<1x1x1xf32>
    %49 = vector.extract %48[0, 0, 0] : f32 from vector<1x1x1xf32>
    %cst_49 = arith.constant 1.95312496E-5 : f32
    %50 = arith.mulf %cst_49, %49 : f32
    %51 = arith.addf %25, %50 : f32
    %c0_50 = arith.constant 0 : index
    %c0_51 = arith.constant 0 : index
    %52 = vector.load %arg10[%c0_50, %c0_51] : memref<32x32xf32, #tpu.memory_space<vmem>>, vector<32x32xf32>
    %c0_52 = arith.constant 0 : index
    %c0_53 = arith.constant 0 : index
    %53 = vector.load %arg11[%c0_52, %c0_53] : memref<32x64xf32, #tpu.memory_space<vmem>>, vector<32x64xf32>
    %c0_54 = arith.constant 0 : index
    %c0_55 = arith.constant 0 : index
    %c0_56 = arith.constant 0 : index
    %c0_57 = arith.constant 0 : index
    %54 = vector.load %arg9[%c0_54, %c0_55, %c0_56, %c0_57] : memref<1x2x32x32xf32, #tpu.memory_space<vmem>>, vector<1x1x32x32xf32>
    %55 = vector.shape_cast %54 : vector<1x1x32x32xf32> to vector<32x32xf32>
    %cst_58 = arith.constant dense<0.000000e+00> : vector<32x32xf32>
    %56 = tpu.matmul %52, %55, %cst_58 {dimension_numbers = #tpu.dot_dimension_numbers<[1], [0], [0], [1], [0, 0, 1, 1], [], []>} : vector<32x32xf32>, vector<32x32xf32>, vector<32x32xf32> -> vector<32x32xf32>
    %cst_59 = arith.constant dense<0.000000e+00> : vector<32x64xf32>
    %57 = tpu.matmul %56, %53, %cst_59 {dimension_numbers = #tpu.dot_dimension_numbers<[1], [0], [0], [1], [0, 0, 1, 1], [], []>} : vector<32x32xf32>, vector<32x64xf32>, vector<32x64xf32> -> vector<32x64xf32>
    %c0_60 = arith.constant 0 : index
    %c0_61 = arith.constant 0 : index
    %c0_62 = arith.constant 0 : index
    %c0_63 = arith.constant 0 : index
    %58 = vector.load %arg2[%c0_60, %c0_61, %c0_62, %c0_63] : memref<1x2x32x64xf32, #tpu.memory_space<vmem>>, vector<1x1x32x64xf32>
    %59 = vector.shape_cast %58 : vector<1x1x32x64xf32> to vector<32x64xf32>
    %60 = arith.subf %59, %57 : vector<32x64xf32>
    %61 = arith.mulf %60, %60 : vector<32x64xf32>
    %c0_64 = arith.constant 0 : index
    %c1_65 = arith.constant 1 : index
    %c0_66 = arith.constant 0 : index
    %c0_67 = arith.constant 0 : index
    %62 = vector.load %arg9[%c0_64, %c1_65, %c0_66, %c0_67] : memref<1x2x32x32xf32, #tpu.memory_space<vmem>>, vector<1x1x32x32xf32>
    %63 = vector.shape_cast %62 : vector<1x1x32x32xf32> to vector<32x32xf32>
    %cst_68 = arith.constant dense<0.000000e+00> : vector<32x32xf32>
    %64 = tpu.matmul %52, %63, %cst_68 {dimension_numbers = #tpu.dot_dimension_numbers<[1], [0], [0], [1], [0, 0, 1, 1], [], []>} : vector<32x32xf32>, vector<32x32xf32>, vector<32x32xf32> -> vector<32x32xf32>
    %cst_69 = arith.constant dense<0.000000e+00> : vector<32x64xf32>
    %65 = tpu.matmul %64, %53, %cst_69 {dimension_numbers = #tpu.dot_dimension_numbers<[1], [0], [0], [1], [0, 0, 1, 1], [], []>} : vector<32x32xf32>, vector<32x64xf32>, vector<32x64xf32> -> vector<32x64xf32>
    %c0_70 = arith.constant 0 : index
    %c1_71 = arith.constant 1 : index
    %c0_72 = arith.constant 0 : index
    %c0_73 = arith.constant 0 : index
    %66 = vector.load %arg2[%c0_70, %c1_71, %c0_72, %c0_73] : memref<1x2x32x64xf32, #tpu.memory_space<vmem>>, vector<1x1x32x64xf32>
    %67 = vector.shape_cast %66 : vector<1x1x32x64xf32> to vector<32x64xf32>
    %68 = arith.subf %67, %65 : vector<32x64xf32>
    %69 = arith.mulf %68, %68 : vector<32x64xf32>
    %70 = arith.addf %61, %69 : vector<32x64xf32>
    %71 = math.sqrt %70 : vector<32x64xf32>
    %72 = vector.shape_cast %71 : vector<32x64xf32> to vector<1x32x64xf32>
    %cst_74 = arith.constant dense<0.000000e+00> : vector<1xf32>
    %73 = vector.multi_reduction <add>, %72, %cst_74 [1, 2] : vector<1x32x64xf32> to vector<1xf32>
    %74 = vector.shape_cast %73 : vector<1xf32> to vector<1x1x1xf32>
    %75 = vector.extract %74[0, 0, 0] : f32 from vector<1x1x1xf32>
    %cst_75 = arith.constant 1.22070313E-4 : f32
    %76 = arith.mulf %cst_75, %75 : f32
    %77 = tpu.iota {dimensions = array<i32: 0>} : vector<8x128xi32>
    %c0_i32 = arith.constant 0 : i32
    %78 = vector.broadcast %c0_i32 : i32 to vector<8x128xi32>
    %79 = arith.cmpi eq, %77, %78 : vector<8x128xi32>
    %cst_76 = arith.constant 0.000000e+00 : f32
    %80 = vector.broadcast %51 : f32 to vector<8x128xf32>
    %81 = vector.broadcast %cst_76 : f32 to vector<8x128xf32>
    %82 = arith.select %79, %80, %81 : vector<8x128xi1>, vector<8x128xf32>
    %c1_i32 = arith.constant 1 : i32
    %83 = vector.broadcast %c1_i32 : i32 to vector<8x128xi32>
    %84 = arith.cmpi eq, %77, %83 : vector<8x128xi32>
    %cst_77 = arith.constant 0.000000e+00 : f32
    %85 = vector.broadcast %76 : f32 to vector<8x128xf32>
    %86 = vector.broadcast %cst_77 : f32 to vector<8x128xf32>
    %87 = arith.select %84, %85, %86 : vector<8x128xi1>, vector<8x128xf32>
    %88 = arith.addf %82, %87 : vector<8x128xf32>
    %c0_78 = arith.constant 0 : index
    %c0_79 = arith.constant 0 : index
    %c0_80 = arith.constant 0 : index
    %c0_81 = arith.constant 0 : index
    %89 = vector.load %arg12[%c0_78, %c0_79, %c0_80, %c0_81] : memref<1x1x8x128xf32, #tpu.memory_space<vmem>>, vector<1x1x8x128xf32>
    %90 = vector.shape_cast %89 : vector<1x1x8x128xf32> to vector<8x128xf32>
    %91 = vector.shape_cast %88 : vector<8x128xf32> to vector<1x1x8x128xf32>
    tpu.vector_store %arg12[%c0_78, %c0_79, %c0_80, %c0_81], %91 {strides = array<i32>} : memref<1x1x8x128xf32, #tpu.memory_space<vmem>>, vector<1x1x8x128xf32>,
    return
  }
  func.func @transform_0(%arg0: i32, %arg1: i32) -> (i32, i32, i32, i32) {
    %c0_i32 = arith.constant 0 : i32
    %c0_i32_0 = arith.constant 0 : i32
    %c0_i32_1 = arith.constant 0 : i32
    return %arg0, %c0_i32, %arg1, %c0_i32_0 : i32, i32, i32, i32
  }
  func.func @transform_1(%arg0: i32, %arg1: i32) -> (i32, i32, i32, i32) {
    %c0_i32 = arith.constant 0 : i32
    %c0_i32_0 = arith.constant 0 : i32
    %c0_i32_1 = arith.constant 0 : i32
    return %arg0, %c0_i32, %arg1, %c0_i32_0 : i32, i32, i32, i32
  }
  func.func @transform_2(%arg0: i32, %arg1: i32) -> (i32, i32) {
    %c0_i32 = arith.constant 0 : i32
    %c0_i32_0 = arith.constant 0 : i32
    %c0_i32_1 = arith.constant 0 : i32
    return %c0_i32, %c0_i32_0 : i32, i32
  }
  func.func @transform_3(%arg0: i32, %arg1: i32) -> (i32, i32) {
    %c0_i32 = arith.constant 0 : i32
    %c0_i32_0 = arith.constant 0 : i32
    %c0_i32_1 = arith.constant 0 : i32
    return %c0_i32, %c0_i32_0 : i32, i32
  }
  func.func @transform_4(%arg0: i32, %arg1: i32) -> (i32, i32, i32, i32) {
    %c0_i32 = arith.constant 0 : i32
    %c0_i32_0 = arith.constant 0 : i32
    %c0_i32_1 = arith.constant 0 : i32
    return %arg0, %c0_i32, %arg1, %c0_i32_0 : i32, i32, i32, i32
  }
  func.func @transform_5(%arg0: i32, %arg1: i32) -> (i32, i32) {
    %c0_i32 = arith.constant 0 : i32
    %c0_i32_0 = arith.constant 0 : i32
    %c0_i32_1 = arith.constant 0 : i32
    return %c0_i32, %c0_i32_0 : i32, i32
  }
  func.func @transform_6(%arg0: i32, %arg1: i32) -> (i32, i32) {
    %c0_i32 = arith.constant 0 : i32
    %c0_i32_0 = arith.constant 0 : i32
    %c0_i32_1 = arith.constant 0 : i32
    return %c0_i32, %c0_i32_0 : i32, i32
  }
  func.func @transform_7(%arg0: i32, %arg1: i32) -> (i32, i32, i32, i32) {
    %c0_i32 = arith.constant 0 : i32
    %c0_i32_0 = arith.constant 0 : i32
    %c0_i32_1 = arith.constant 0 : i32
    %c0_i32_2 = arith.constant 0 : i32
    return %arg0, %c0_i32, %c0_i32_0, %c0_i32_1 : i32, i32, i32, i32
  }
  func.func @transform_8(%arg0: i32, %arg1: i32) -> (i32, i32) {
    %c0_i32 = arith.constant 0 : i32
    %c0_i32_0 = arith.constant 0 : i32
    return %arg1, %c0_i32 : i32, i32
  }
  func.func @transform_9(%arg0: i32, %arg1: i32) -> (i32, i32) {
    %c0_i32 = arith.constant 0 : i32
    %c0_i32_0 = arith.constant 0 : i32
    %c0_i32_1 = arith.constant 0 : i32
    return %c0_i32, %c0_i32_0 : i32, i32
  }
  func.func @transform_10(%arg0: i32, %arg1: i32) -> (i32, i32, i32, i32) {
    %c0_i32 = arith.constant 0 : i32
    %c0_i32_0 = arith.constant 0 : i32
    %c0_i32_1 = arith.constant 0 : i32
    return %arg0, %arg1, %c0_i32, %c0_i32_0 : i32, i32, i32, i32
  }
}

</mosaic_0001>

<bundles_post_ra>
// kernel: tpu_custom_call.1
= control target key start
LH: loop header
LB: loop body
LE: loop exit
PB: predicated region body
PF: predicated region fallthrough
CT: control target
= control target key end

     0   :  { %s3767_s0 = inlined_call_operand.vmem [shape: f32[2,2,64,64], index: 0, kind: input, shape index: {}]   ;;  %s3768_s1 = inlined_call_operand.hbm [shape: f32[2,2,32,32], index: 1, kind: input, shape index: {}]   ;;  %s3769_s2 = inlined_call_operand.hbm [shape: f32[16,32], index: 2, kind: input, shape index: {}]   ;;  %s3770_s3 = inlined_call_operand.vmem [shape: f32[64,32], index: 3, kind: input, shape index: {}]   ;;  %s3771_s4 = inlined_call_operand.hbm [shape: f32[2,2,16,16], index: 4, kind: input, shape index: {}]   ;;  %s3772_s5 = inlined_call_operand.hbm [shape: f32[8,32], index: 5, kind: input, shape index: {}]   ;;  %s3773_s6 = inlined_call_operand.vmem [shape: f32[64,16], index: 6, kind: input, shape index: {}]   ;;  %s3774_s7 = inlined_call_operand.hbm [shape: f32[2,2,32,32], index: 7, kind: input, shape index: {}]   ;;  %s3775_s8 = inlined_call_operand.vmem [shape: f32[64,32], index: 8, kind: input, shape index: {}]   ;;  %s3776_s9 = inlined_call_operand.hbm [shape: f32[32,64], index: 9, kind: input, shape index: {}]   ;;  %s3777_s10 = inlined_call_operand.hbm [shape: f32[2,2,8,128], index: 10, kind: output, shape index: {}]  }
   0x1   :  { %3804 = sst [smem:[#allocation38_spill]] %s3770_s3 }
   0x2   :  { %3805 = sst [smem:[#allocation39_spill]] %s3773_s6 }
   0x3   :  { %3806 = sst [smem:[#allocation40_spill]] %s3775_s8 }
   0x4   :  { %3807 = sst [smem:[#allocation41_spill]] %s3777_s10 }
   0x5   :  { %15 = vsyncpa [#allocation4], 0 }
   0x6   :  { %17 = vsyncpa [#allocation4 + $0x1], 0 }
   0x7   :  { %18 = vsyncpa [#allocation7], 0 }
   0x8   :  { %19 = vsyncpa [#allocation11], 0 }
   0x9   :  { %21 = vsyncpa [#allocation11 + $0x1], 0 }
   0xa   :  { %22 = vsyncpa [#allocation5], 0 }
   0xb   :  { %24 = vsyncpa [#allocation5 + $0x1], 0  ;;  %s3128_s13 = smov 0   ;;  %s3130_s14 = smov 0  }
   0xc   :  { %s3132_s15 = smov 0   ;;  %s3134_s16 = smov 0  }
   0xd   :  { %s3136_s17 = smov 0   ;;  %s3138_s18 = smov 0  }
   0xe   :  { %s3140_s19 = smov 0   ;;  %s3142_s20 = smov 0  }
   0xf   :  { %s3144_s21 = smov 0   ;;  %s3146_s22 = smov 0  }
  0x10   :  { %s3148_s23 = smov 0  }
  0x11 LB: > { %3808 = sst [smem:[#allocation24_spill]] %s3015_s14  ;;  %s3184_s24 = sadd.s32 4294967295, %s3051_s23   ;;  %s3051_s23 = sphi %s3148_s23, %s30_s23   ;;  %s3047_s22 = sphi %s3146_s22, %s3874_s22   ;;  %s3043_s21 = sphi %s3144_s21, %s3873_s21   ;;  %s3039_s20 = sphi %s3142_s20, %s3872_s20   ;;  %s3035_s19 = sphi %s3140_s19, %s3871_s19   ;;  %s3031_s18 = sphi %s3138_s18, %s3870_s18   ;;  %s3027_s17 = sphi %s3136_s17, %s3869_s17   ;;  %s3023_s16 = sphi %s3134_s16, %s3863_s16   ;;  %s3019_s15 = sphi %s3132_s15, %s3868_s15   ;;  %s3015_s14 = sphi %s3130_s14, %s3867_s14   ;;  %s3011_s13 = sphi %s3128_s13, %s3861_s13  }
  0x12   : > { %3809 = sst [smem:[#allocation25_spill]] %s3023_s16  ;;  %s2094_s25 = sadd.s32 4294967294, %s3051_s23  }
  0x13   : > { %3810 = sst [smem:[#allocation26_spill]] %s3027_s17  ;;  %s39_s26 = sadd.s32 1, %s3043_s21 }
  0x14   : > { %3811 = sst [smem:[#allocation27_spill]] %s3035_s19  ;;  %s42_s27 = sadd.s32 1, %s3047_s22 }
  0x15   : > { %3812 = sst [smem:[#allocation28_spill]] %s3039_s20  ;;  %p40_p0 = scmp.ge.s32.totalorder %s39_s26, 2 }
  0x16   : > { %3813 = sst [smem:[#allocation29_spill]] %s3184_s24  ;;  %s51_s28 = sadd.s32 1, %s3031_s18 }
  0x17   : > { %p58_p1 = scmp.ne.s32.totalorder %s3031_s18, %s3027_s17  ;;  %p59_p2 = scmp.eq.s32.totalorder %s3051_s23, 0 }
  0x18   : > { %s3876_s26 = smov (%p40_p0, %s39_s26), 0  ;;  %s3878_s27 = smov (!%p40_p0, %s42_s27), %s3047_s22 }
  0x19   : > { %3814 = sst [smem:[#allocation30_spill]] %s3876_s26  ;;  %s47_s29 = ssub.s32 %s3043_s21, %s3876_s26 }
  0x1a   : > { %p3203_p3 = por %p59_p2, %p58_p1  ;;  %p44_p4 = scmp.ge.s32.totalorder %s3878_s27, 2 }
  0x1b   : > { %p3782_p5 = scmp.ne.s32.totalorder %s3027_s17, %s3023_s16  ;;  %p3793_p6 = scmp.eq.s32.totalorder %s3184_s24, 0 }
  0x1c   : > { %s3815_s30 = scalar_select %p3203_p3, 1, 0 }
  0x1d   : > { %s217_s11 = sadd.s32 1, %s3019_s15  ;;  %s3880_s27 = smov (%p44_p4, %s3878_s27), 0 }
  0x1e   : > { %3816 = sst [smem:[#allocation31_spill]] %s3880_s27  ;;  %p3218_p7 = por %p3793_p6, %p3782_p5 }
  0x1f   : > { %p224_p8 = scmp.ne.s32.totalorder %s3019_s15, %s3015_s14  ;;  %s46_s26 = ssub.s32 %s3047_s22, %s3880_s27 }
  0x20   : > { %s3817_s12 = scalar_select %p3218_p7, 1, 0 }
  0x21   : > { %p230_p9 = scmp.ne.s32.totalorder %s3015_s14, %s3011_s13  ;;  %s48_s10 = sor.u32 %s47_s29, %s46_s26 }
  0x22   : > { %3818 = sst [smem:[#allocation32_spill]] %s3817_s12  ;;  %p215_p10 = scmp.eq.s32.totalorder %s46_s26, 0 }
  0x23   : > { %p49_p11 = scmp.eq.s32.totalorder %s48_s10, 0  ;;  %p3230_p12 = por %p224_p8, %p59_p2 }
  0x24   : > { %s3235_s8 = scalar_select %p215_p10, %s3019_s15, %s217_s11  }
  0x25   : > { %s3819_s20 = scalar_select %p3230_p12, 1, 0 }
  0x26   : > { %3820 = sst [smem:[#allocation33_spill]] %s3235_s8  ;;  %p3242_p13 = por %p230_p9, %p3793_p6 }
  0x27   : > { %s3238_s19 = scalar_select %p49_p11, %s3031_s18, %s51_s28  }
  0x28   : > { %s3822_s6 = scalar_select %p3242_p13, 1, 0 }
  0x29   : > { %3821 = sst [smem:[#allocation34_spill]] %s3238_s19  ;;  %p303_p0 = scmp.eq.s32.totalorder %s3184_s24, 3 }
  0x2a   : > { %3823 = sst [smem:[#allocation35_spill]] %s3822_s6  ;;  %p309_p4 = scmp.eq.s32.totalorder %s2094_s25, 3 }
  0x2b   : > { %p2095_p5 = scmp.ge.s32.totalorder %s3051_s23, 1  ;;  %p3251_p7 = por %p303_p0, %p58_p1 }
  0x2c   : > { %p316_p2 = scmp.lt.s32.totalorder %s3051_s23, 5  ;;  %p3826_p8 = scmp.ne.s32.totalorder %s3027_s17, %s3023_s16 }
  0x2d   : > { %s3824_s10 = scalar_select %p3251_p7, 1, 0 }
  0x2e   : > { %p3259_p12 = por %p309_p4, %p3826_p8  ;;  %p3263_p10 = pnand %p2095_p5, %p316_p2 }
  0x2f   : > { %3825 = sst [smem:[#allocation36_spill]] %s3824_s10  ;;  %s3053_s28 = smov [#allocation6]  }
  0x30   : > { %s3827_s13 = scalar_select %p3259_p12, 1, 0 }
  0x31   : > { %s3829_s26 = scalar_select %p3263_p10, 1, 0 }
  0x32   : > { %3828 = sst [smem:[#allocation37_spill]] %s3827_s13  ;;  %s328_s29 = sshll.u32 %s3053_s28, 4  ;;  %s3269_s29 = int_to_ptr.vmem [resolvable:$true] %s328_s29 }
  0x33   : > { %p2629_p9 = pneg %p3263_p10  ;;  %s3054_s11 = smov [#allocation9]  }
  0x34   : > { %s345_s27 = sshll.u32 %s3054_s11, 4  ;;  %s3055_s19 = smov [#allocation12]   ;;  %s3277_s27 = int_to_ptr.vmem [resolvable:$true] %s345_s27 }
  0x35   : > { %p3273_p1 = pnand %p2629_p9, %p3793_p6  ;;  %s3279_s8 = sshll.u32 %s3055_s19, 4  ;;  %s359_s8 = int_to_ptr.vmem [resolvable:$true] %s3279_s8 }
  0x36   : > { %s2769_s28 = scalar_lea.hbm %s3769_s2, 256 }
  0x37   : > { %p2770_p5 = scmp.ne.s32.totalorder %s3769_s2, %s2769_s28  ;;  %p3289_p11 = pneg %p3273_p1 }
  0x38   : > { %p2776_p2 = scmp.lt.u32.totalorder %s2769_s28, %s3769_s2 }
  0x39   : > { %p2772_p0 = pnand %p3289_p11, %p2770_p5 }
  0x3b   : > { %p2773_p4 = pneg %p2772_p0 }
  0x3d   : > { %p2778_p8 = pnand %p2776_p2, %p2773_p4 }
  0x3f   : > { %2781 = shalt.err (!%p2778_p8)
}
  0x40   : > { %s2782_s3 = scalar_lea.vmem %s3269_s29, 256  ;;  %p2790_p7 = scmp.lt.s32.totalorder %s3269_s29, %s3269_s29 }
  0x41   : > { %p2783_p9 = scmp.ne.s32.totalorder %s3269_s29, %s2782_s3  ;;  %p2791_p13 = scmp.lt.s32.totalorder %s2782_s3, %s2782_s3 }
  0x43   : > { %p2785_p6 = pnand %p2783_p9, %p3289_p11  ;;  %p2792_p5 = por %p2791_p13, %p2790_p7 }
  0x45   : > { %p2786_p12 = pneg %p2785_p6 }
  0x47   : > { %p2793_p0 = pnand %p2792_p5, %p2786_p12 }
  0x49   : > { %2796 = shalt.err (!%p2793_p0)
}
  0x4a   : > { %s3056_s16 = smov 128   ;;  %s3057_s10 = smov 8  }
  0x4b   : > { %2632 = dma.hbm_to_vmem [thread:$0]  (!%p3273_p1), %s3769_s2, 256, %s3269_s29, [#allocation7], %s3056_s16, %s3056_s16, %s3057_s10  }
  0x4c   : > { %s2797_s3 = scalar_lea.hbm %s3772_s5, 128 }
  0x4d   : > { %p2798_p6 = scmp.ne.s32.totalorder %s3772_s5, %s2797_s3  ;;  %p2804_p13 = scmp.lt.u32.totalorder %s2797_s3, %s3772_s5 }
  0x4f   : > { %p2800_p7 = pnand %p2798_p6, %p3289_p11 }
  0x51   : > { %p2801_p12 = pneg %p2800_p7 }
  0x53   : > { %p2806_p4 = pnand %p2804_p13, %p2801_p12 }
  0x55   : > { %2809 = shalt.err (!%p2806_p4)
}
  0x56   : > { %s2810_s29 = scalar_lea.vmem %s3277_s27, 128  ;;  %p2818_p5 = scmp.lt.s32.totalorder %s3277_s27, %s3277_s27 }
  0x57   : > { %p2811_p2 = scmp.ne.s32.totalorder %s3277_s27, %s2810_s29  ;;  %p2819_p0 = scmp.lt.s32.totalorder %s2810_s29, %s2810_s29 }
  0x59   : > { %p2813_p8 = pnand %p2811_p2, %p3289_p11  ;;  %p2820_p6 = por %p2819_p0, %p2818_p5 }
  0x5b   : > { %p2814_p9 = pneg %p2813_p8 }
  0x5d   : > { %p2821_p7 = pnand %p2820_p6, %p2814_p9 }
  0x5f   : > { %2824 = shalt.err (!%p2821_p7)
}
  0x60   : > { %2635 = dma.hbm_to_vmem [thread:$0]  (!%p3273_p1), %s3772_s5, 128, %s3277_s27, [#allocation7]  }
  0x61   : > { %s2825_s13 = scalar_lea.hbm %s3776_s9, 512 }
  0x62   : > { %p2826_p12 = scmp.ne.s32.totalorder %s3776_s9, %s2825_s13  ;;  %p2832_p2 = scmp.lt.u32.totalorder %s2825_s13, %s3776_s9 }
  0x64   : > { %p2828_p13 = pnand %p2826_p12, %p3289_p11 }
  0x66   : > { %p2829_p4 = pneg %p2828_p13 }
  0x68   : > { %p2834_p8 = pnand %p2832_p2, %p2829_p4 }
  0x6a   : > { %2837 = shalt.err (!%p2834_p8)
}
  0x6b   : > { %s2838_s29 = scalar_lea.vmem %s359_s8, 512  ;;  %p2846_p6 = scmp.lt.s32.totalorder %s359_s8, %s359_s8 }
  0x6c   : > { %p2839_p9 = scmp.ne.s32.totalorder %s359_s8, %s2838_s29  ;;  %p2847_p7 = scmp.lt.s32.totalorder %s2838_s29, %s2838_s29 }
  0x6e   : > { %p2841_p5 = pnand %p2839_p9, %p3289_p11  ;;  %p2848_p10 = por %p2847_p7, %p2846_p6 }
  0x70   : > { %p2842_p0 = pneg %p2841_p5 }
  0x72   : > { %p2849_p3 = pnand %p2848_p10, %p2842_p0 }
  0x74   : > { %2852 = shalt.err (!%p2849_p3)
}
  0x75   : > { %2638 = dma.hbm_to_vmem [thread:$0]  (!%p3273_p1), %s3776_s9, 512, %s359_s8, [#allocation11], %s3056_s16, %s3056_s16, %s3057_s10  }
  0x76   : > { %p2099_p12 = scmp.ge.s32.totalorder %s3051_s23, 4 }
  0x77   : > { %p3832_p11 = scmp.ne.s32.totalorder (!%p2099_p12), %s3815_s30, 0 }
  0x78   : > { %368 = sbr.rel (%p2099_p12) target bundleno = 206 (0xce), region = 36 }
  0x7f   : > { %371 = sbr.rel (!%p3832_p11) target bundleno = 138 (0x8a), region = 40  ;;  %s373_s6 = sand.u32 (%p3832_p11), 1, %s3031_s18  }
  0x80   : > { %s2101_s17 = sshll.u32 (%p3832_p11), %s3043_s21, 2  ;;  %s2100_s24 = sshll.u32 (%p3832_p11), %s373_s6, 6 }
  0x81   : > { %s2102_s25 = sshll.u32 (%p3832_p11), %s3047_s22, 4  ;;  %s375_s8 = scalar_lea.vmem (%p3832_p11), [#allocation2], %s2100_s24 }
  0x82   : > { %s378_s12 = sadd.s32 (%p3832_p11), %s2102_s25, %s2101_s17 }
  0x83   : > { %s2103_s13 = sshll.u32 (%p3832_p11), %s378_s12, 3 }
  0x84   : > { %s380_s19 = scalar_lea.vmem (%p3832_p11), %s3767_s0, %s2103_s13 }
  0x85   : > { %v422_v0 = vld [vmem:[%s380_s19] sm:$0xff] (%p3832_p11)  ;;  %v424_v1 = vld [vmem:[%s380_s19 + $0x8] sm:$0xff] (%p3832_p11)  ;;  %v426_v2 = vld [vmem:[%s380_s19 + $0x10] sm:$0xff] (%p3832_p11) }
  0x86   : > { %423 = vst [vmem:[%s375_s8] sm:$0xff] %v422_v0  ;;  %425 = vst [vmem:[%s375_s8 + $0x8] sm:$0xff] %v424_v1  ;;  %v428_v3 = vld [vmem:[%s380_s19 + $0x18] sm:$0xff]  ;;  %v430_v4 = vld [vmem:[%s380_s19 + $0x40] sm:$0xff] }
  0x87   : > { %427 = vst [vmem:[%s375_s8 + $0x10] sm:$0xff] %v426_v2  ;;  %v432_v5 = vld [vmem:[%s380_s19 + $0x48] sm:$0xff]  ;;  %429 = vst [vmem:[%s375_s8 + $0x18] sm:$0xff] %v428_v3  ;;  %v434_v6 = vld [vmem:[%s380_s19 + $0x50] sm:$0xff] }
  0x88   : > { %431 = vst [vmem:[%s375_s8 + $0x20] sm:$0xff] %v430_v4  ;;  %433 = vst [vmem:[%s375_s8 + $0x28] sm:$0xff] %v432_v5  ;;  %v436_v7 = vld [vmem:[%s380_s19 + $0x58] sm:$0xff] }
  0x89   : > { %435 = vst [vmem:[%s375_s8 + $0x30] sm:$0xff] %v434_v6  ;;  %437 = vst [vmem:[%s375_s8 + $0x38] sm:$0xff] %v436_v7 }
  0x8a PF: > { %s446_s16 = sand.u32 1, %s3031_s18   ;;  %s2105_s3 = sshll.u32 %s3043_s21, 1 }
  0x8b   : > { %s2104_s10 = sshll.u32 %s446_s16, 5  ;;  %s2106_s29 = sshll.u32 %s3047_s22, 3 }
  0x8c   : > { %s444_s27 = sand.u32 1, %s3051_s23   ;;  %s454_s14 = sadd.s32 %s2106_s29, %s2105_s3 }
  0x8d   : > { %s448_s6 = scalar_lea.vmem [#allocation3], %s2104_s10  ;;  %s2107_s24 = sshll.u32 %s454_s14, 7 }
  0x8e   : > { %s469_s17 = sshll.u32 %s448_s6, 4  ;;  %s3058_s25 = smov 512   ;;  %s470_s17 = int_to_ptr.vmem [resolvable:$true] %s469_s17 }
  0x8f   : > { %p3833_p3 = scmp.ne.s32.totalorder %s3815_s30, 0  ;;  %s3059_s28 = smov 256  }
  0x90   : > { %s3060_s11 = smov 2   ;;  %s3061_s19 = smov 128  }
  0x91   : > { %2609 = sst [smem:[#allocation15]] (%p3833_p3), %s3058_s25  ;;  %s3062_s8 = smov 8  }
  0x92   : > { %s2608_s12 = scalar_select %p3833_p3, [#allocation0], [#allocation16] }
  0x93   : > { %2610 = sst [smem:[#allocation15 + $0x1]] (%p3833_p3), %s3059_s28  ;;  %s456_s29 = scalar_lea.hbm %s3768_s1, %s2107_s24 }
  0x94   : > { %s461_s13 = sld [smem:[%s2608_s12]]   ;;  %s3392_s25 = scalar_lea.sflag [#allocation4], %s444_s27 }
  0x95   : > { %2611 = sst [smem:[#allocation15 + $0x2]] (%p3833_p3), %s3060_s11  ;;  %s3063_s12 = smov [#allocation14]  }
  0x96   : > { %2612 = sst [smem:[#allocation15 + $0x3]] (%p3833_p3), %s3061_s19  ;;  %s2110_s28 = sshll.u32 %s446_s16, 4 }
  0x97   : > { %2613 = sst [smem:[#allocation15 + $0x4]] (%p3833_p3), %s3061_s19  ;;  %s2111_s11 = sshll.u32 %s3047_s22, 2 }
  0x98   : > { %2614 = sst [smem:[#allocation15 + $0x5]] (%p3833_p3), %s3062_s8  ;;  %s501_s19 = sadd.s32 %s3043_s21, %s2111_s11 }
  0x99   : > { %s2112_s8 = sshll.u32 %s501_s19, 7  ;;  %s496_s10 = scalar_lea.vmem [#allocation8], %s2110_s28 }
  0x9a   : > { %s2108_s14 = sshll.u32 %s461_s13, 26  ;;  %s504_s24 = sshll.u32 %s496_s10, 4  ;;  %s3406_s24 = int_to_ptr.vmem [resolvable:$true] %s504_s24 }
  0x9b   : > { %s2109_s6 = sadd.s32 134217728, %s2108_s14  ;;  %s3404_s14 = scalar_lea.hbm %s3771_s4, %s2112_s8 }
  0x9c   : > { %2615 = dma.general (%p3833_p3), %s456_s29, 512, %s470_s17, %s3392_s25, %s3063_s12, [#allocation15], %s2109_s6, 0  }
  0x9d   : > { %s2853_s17 = scalar_lea.hbm %s3404_s14, 256  ;;  %s2857_s6 = scalar_lea.hbm %s3771_s4, 1024 }
  0x9e   : > { %p2854_p10 = scmp.ne.s32.totalorder %s3404_s14, %s2853_s17  ;;  %p2858_p4 = scmp.lt.u32.totalorder %s3404_s14, %s3771_s4 }
  0x9f   : > { %p2859_p2 = scmp.lt.u32.totalorder %s2857_s6, %s2853_s17  ;;  %p2861_p9 = scmp.lt.u32.totalorder %s2853_s17, %s3404_s14 }
  0xa0   : > { %p2855_p1 = pnand %p2854_p10, %p3833_p3 }
  0xa1   : > { %p2860_p8 = por %p2859_p2, %p2858_p4 }
  0xa2   : > { %p2856_p13 = pneg %p2855_p1 }
  0xa3   : > { %p2862_p5 = por %p2861_p9, %p2860_p8 }
  0xa5   : > { %p2863_p0 = pnand %p2862_p5, %p2856_p13 }
  0xa7   : > { %2866 = shalt.err (!%p2863_p0)
}
  0xa8   : > { %s2867_s11 = scalar_lea.vmem %s3406_s24, 256  ;;  %s3064_s19 = smov [#allocation8]  }
  0xa9   : > { %p2868_p6 = scmp.ne.s32.totalorder %s3406_s24, %s2867_s11  ;;  %s2871_s8 = sshll.u32 %s3064_s19, 4  ;;  %s2872_s8 = int_to_ptr.vmem [resolvable:$false] %s2871_s8 }
  0xaa   : > { %s2873_s10 = scalar_lea.vmem %s2872_s8, 512  ;;  %p2874_p11 = scmp.lt.s32.totalorder %s3406_s24, %s2872_s8 }
  0xab   : > { %p2869_p7 = pnand %p2868_p6, %p3833_p3  ;;  %p2875_p10 = scmp.lt.s32.totalorder %s2873_s10, %s2867_s11 }
  0xad   : > { %p2870_p12 = pneg %p2869_p7  ;;  %p2876_p1 = por %p2875_p10, %p2874_p11 }
  0xaf   : > { %p2877_p4 = pnand %p2876_p1, %p2870_p12 }
  0xb1   : > { %2880 = shalt.err (!%p2877_p4)
}
  0xb2   : > { %s3065_s13 = smov 256   ;;  %s3066_s3 = smov 128  }
  0xb3   : > { %s3067_s17 = smov 8   ;;  %s516_s16 = sand.u32 1, %s3019_s15  }
  0xb4   : > { %2616 = dma.hbm_to_vmem [thread:$0]  (%p3833_p3), %s3404_s14, 256, %s3406_s24, %s3392_s25, %s3065_s13, %s3066_s3, %s3067_s17  }
  0xb5   : > { %s2181_s29 = sshll.u32 %s3047_s22, 10  ;;  %s2113_s6 = sshll.u32 %s516_s16, 6 }
  0xb6   : > { %s3437_s11 = scalar_lea.hbm %s3774_s7, %s2181_s29  ;;  %s518_s19 = scalar_lea.vmem [#allocation10], %s2113_s6 }
  0xb7   : > { %s525_s8 = sshll.u32 %s518_s19, 4  ;;  %s3443_s30 = scalar_lea.sflag [#allocation11], %s444_s27  ;;  %s3439_s8 = int_to_ptr.vmem [resolvable:$true] %s525_s8 }
  0xb8   : > { %s2881_s25 = scalar_lea.hbm %s3437_s11, 1024  ;;  %p3834_p13 = scmp.ne.s32.totalorder %s3819_s20, 0 }
  0xb9   : > { %p2882_p3 = scmp.ne.s32.totalorder %s3437_s11, %s2881_s25  ;;  %s2885_s10 = scalar_lea.hbm %s3774_s7, 2048 }
  0xba   : > { %p2886_p9 = scmp.lt.u32.totalorder %s3437_s11, %s3774_s7  ;;  %p2887_p5 = scmp.lt.u32.totalorder %s2885_s10, %s2881_s25 }
  0xbb   : > { %p2883_p2 = pnand %p2882_p3, %p3834_p13  ;;  %p2889_p6 = scmp.lt.u32.totalorder %s2881_s25, %s3437_s11 }
  0xbc   : > { %p2888_p0 = por %p2887_p5, %p2886_p9 }
  0xbd   : > { %p2884_p8 = pneg %p2883_p2 }
  0xbe   : > { %p2890_p7 = por %p2889_p6, %p2888_p0 }
  0xc0   : > { %p2891_p12 = pnand %p2890_p7, %p2884_p8 }
  0xc2   : > { %2894 = shalt.err (!%p2891_p12)
}
  0xc3   : > { %s2895_s27 = scalar_lea.vmem %s3439_s8, 1024  ;;  %s3068_s29 = smov [#allocation10]  }
  0xc4   : > { %p2896_p11 = scmp.ne.s32.totalorder %s3439_s8, %s2895_s27  ;;  %s2899_s6 = sshll.u32 %s3068_s29, 4  ;;  %s2900_s6 = int_to_ptr.vmem [resolvable:$false] %s2899_s6 }
  0xc5   : > { %s2901_s12 = scalar_lea.vmem %s2900_s6, 2048  ;;  %p2902_p4 = scmp.lt.s32.totalorder %s3439_s8, %s2900_s6 }
  0xc6   : > { %p2897_p10 = pnand %p2896_p11, %p3834_p13  ;;  %p2903_p3 = scmp.lt.s32.totalorder %s2901_s12, %s2895_s27 }
  0xc8   : > { %p2898_p1 = pneg %p2897_p10  ;;  %p2904_p2 = por %p2903_p3, %p2902_p4 }
  0xca   : > { %p2905_p9 = pnand %p2904_p2, %p2898_p1 }
  0xcc   : > { %2908 = shalt.err (!%p2905_p9)
}
  0xcd   : > { %2617 = dma.hbm_to_vmem [thread:$0]  (%p3834_p13), %s3437_s11, 1024, %s3439_s8, %s3443_s30, %s3066_s3, %s3066_s3, %s3067_s17  }
  0xce PF: > { %p3835_p8 = scmp.ne.s32.totalorder %s3829_s26, 0 }
  0xcf   : > { %s3836_s28 = sld [smem:[#allocation26_spill]] (!%p3835_p8)  ;;  %s3838_s25 = sld [smem:[#allocation32_spill]] (!%p3835_p8) }
  0xd0   : > { %546 = sbr.rel (%p3835_p8) target bundleno = 1900 (0x76c), region = 94  ;;  %s3837_s19 = sld [smem:[#allocation29_spill]] (!%p3835_p8) }
  0xd5   : > { %s3473_s24 = sand.u32 (!%p3835_p8), 1, %s3836_s28   ;;  %p3839_p13 = scmp.ne.s32.totalorder (!%p3835_p8), %s3838_s25, 0 }
  0xd6   : > { %s555_s14 = sand.u32 (!%p3835_p8), 1, %s3837_s19   ;;  %s2117_s20 = sshll.u32 (!%p3835_p8), %s3473_s24, 6 }
  0xd7   : > { %s2118_s10 = sshll.u32 %s3473_s24, 5  ;;  %s3478_s13 = scalar_lea.vmem [#allocation2], %s2117_s20 }
  0xd8   : > { %s556_s16 = scalar_lea.sflag [#allocation4], %s555_s14  ;;  %s3480_s27 = scalar_lea.vmem [#allocation3], %s2118_s10 }
  0xd9   : > { %2982 = dma.done.wait (%p3839_p13), %s556_s16, 512  }
  0xda   : > { %2984 = vsyncadd (%p3839_p13), %s556_s16, 4294966784  ;;  %p3840_p5 = scmp.eq.s32.totalorder %s3837_s19, 0 }
  0xdc   : > { %2986 = dma.done.wait (%p3840_p5), [#allocation7], 256   ;;  %p3841_p0 = pmov %p3840_p5 }
  0xdd   : > { %s2120_s26 = sshll.u32 %s3473_s24, 4 }
  0xde   : > { %2988 = vsyncadd (%p3841_p0), [#allocation7], 4294967040  ;;  %s3491_s3 = scalar_lea.vmem [#allocation8], %s2120_s26 }
  0xdf   : > { %2990 = dma.done.wait (%p3839_p13), %s556_s16, 256  }
  0xe0   : > { %2992 = vsyncadd (%p3839_p13), %s556_s16, 4294967040  ;;  %p3842_p6 = pmov %p3841_p0 }
  0xe1   : > { %p3843_p7 = pmov %p3841_p0 }
  0xe2   : > { %2994 = dma.done.wait (%p3842_p6), [#allocation7], 128  }
  0xe3   : > { %2996 = vsyncadd (%p3843_p7), [#allocation7], 4294967168  ;;  %s3844_s17 = sld [smem:[#allocation24_spill]]  ;;  %s3845_s11 = sld [smem:[#allocation35_spill]] }
  0xe4   : > { %s582_s29 = scalar_lea.sflag [#allocation11], %s555_s14 }
  0xe9   : > { %s583_s8 = sand.u32 1, %s3844_s17   ;;  %p3846_p12 = scmp.ne.s32.totalorder %s3845_s11, 0 }
  0xea   : > { %s2122_s30 = sshll.u32 %s583_s8, 6 }
  0xeb   : > { %s3502_s6 = scalar_lea.vmem [#allocation10], %s2122_s30 }
  0xec   : > { %2998 = dma.done.wait (%p3846_p12), %s582_s29, 1024  }
  0xed   : > { %3000 = vsyncadd (%p3846_p12), %s582_s29, 4294966272  ;;  %p3847_p11 = pmov %p3841_p0 }
  0xee   : > { %p3848_p10 = pmov %p3841_p0 }
  0xef   : > { %3002 = dma.done.wait (%p3847_p11), [#allocation11], 512  }
  0xf0   : > { %3004 = vsyncadd (%p3848_p10), [#allocation11], 4294966784  ;;  %s3849_s25 = sld [smem:[#allocation38_spill]]  ;;  %vm667_vm0 = vcmask 523264   ;;  %v3531_v16 = vld [vmem:[%s3478_s13] sm:$0xff]  ;;  %v3542_v21 = vld [vmem:[%s3478_s13 + $0x8] sm:$0xff] }
  0xf1   : > { %2300 = vmatprep.mubr.msk.f32.mxu0 %vm667_vm0, %v3531_v16  ;;  %v3545_v22 = vld [vmem:[%s3478_s13 + $0x10] sm:$0xff]  ;;  %v3552_v23 = vld [vmem:[%s3478_s13 + $0x18] sm:$0xff]  ;;  %v653_v24 = vld [vmem:[#allocation6] sm:$0xff]  ;;  %vm765_vm1 = vcmask 261120   ;;  %s3850_s16 = sld [smem:[#allocation39_spill]]  ;;  %v3069_v56 = vmov 0.0|0.0  }
  0xf2   : > { %2314 = vmatprep.mubr.msk.f32.mxu1 %vm765_vm1, %v653_v24  ;;  %v654_v31 = vld [vmem:[#allocation6 + $0x8] sm:$0xff]  ;;  %v3559_v32 = vld [vmem:[%s3478_s13 + $0x20] sm:$0xff]  ;;  %v3568_v34 = vld [vmem:[%s3478_s13 + $0x30] sm:$0xff]  ;;  %vm3070_vm2 = vmmov 0   ;;  %v3071_v57 = vmov 0.0   ;;  %s3853_s30 = sld [smem:[#allocation40_spill]] }
  0xf3   : > { %v3565_v33 = vld [vmem:[%s3478_s13 + $0x28] sm:$0xff]  ;;  %v3575_v35 = vld [vmem:[%s3478_s13 + $0x38] sm:$0xff]  ;;  %v847_v59 = vld [vmem:[%s3480_s27] sm:$0xff]  ;;  %vm1404_vm8 = vcmask 130048   ;;  %s2124_s14 = sshll.u32 %s3473_s24, 3  ;;  %s3855_s11 = sld [smem:[#allocation36_spill]] }
  0xf4   : > { %v848_v58 = vld [vmem:[%s3480_s27 + $0x8] sm:$0xff]  ;;  %v2144_v60 = vld [vmem:[%s3480_s27 + $0x18] sm:$0xff]  ;;  %v2143_v62 = vld [vmem:[%s3480_s27 + $0x10] sm:$0xff]  ;;  %s3852_s27 = sld [smem:[#allocation27_spill]] }
  0xf6   : > { %v655_v8 = vld [vmem:[%s3849_s25] sm:$0xff]  ;;  %v656_v9 = vld [vmem:[%s3849_s25 + $0x8] sm:$0xff]  ;;  %v657_v10 = vld [vmem:[%s3849_s25 + $0x10] sm:$0xff] }
  0xf7   : > { %v2472_v11 = vpack.c.bf16 %v656_v9, %v655_v8  ;;  %v658_v12 = vld [vmem:[%s3849_s25 + $0x18] sm:$0xff]  ;;  %v659_v14 = vld [vmem:[%s3849_s25 + $0x20] sm:$0xff]  ;;  %v660_v15 = vld [vmem:[%s3849_s25 + $0x28] sm:$0xff]  ;;  %s3851_s26 = smov %s3850_s16 }
  0xf8   : > { %v2476_v13 = vpack.c.bf16 %v658_v12, %v657_v10  ;;  %v2480_v17 = vpack.c.bf16 %v660_v15, %v659_v14  ;;  %v661_v18 = vld [vmem:[%s3849_s25 + $0x30] sm:$0xff]  ;;  %v662_v19 = vld [vmem:[%s3849_s25 + $0x38] sm:$0xff]  ;;  %v1068_v41 = vld [vmem:[%s3850_s16] sm:$0xff] }
  0xf9   : > { %2473 = vmatprep.subr.bf16.mxu0 %v2472_v11  ;;  %v2484_v20 = vpack.c.bf16 %v662_v19, %v661_v18  ;;  %v1069_v42 = vld [vmem:[%s3851_s26 + $0x8] sm:$0xff]  ;;  %v1070_v47 = vld [vmem:[%s3851_s26 + $0x10] sm:$0xff]  ;;  %v1071_v48 = vld [vmem:[%s3851_s26 + $0x18] sm:$0xff]  ;;  %p3857_p3 = scmp.ne.s32.totalorder %s3855_s11, 0 }
  0xfa   : > { %2475 = vmatpush3.bf16.msra.mxu0 %v2472_v11  ;;  %v3585_v46 = vpack.c.bf16 %v1069_v42, %v1068_v41  ;;  %v3594_v49 = vpack.c.bf16 %v1071_v48, %v1070_v47  ;;  %v1072_v50 = vld [vmem:[%s3851_s26 + $0x20] sm:$0xff]  ;;  %v1073_v51 = vld [vmem:[%s3851_s26 + $0x28] sm:$0xff]  ;;  %v1074_v53 = vld [vmem:[%s3851_s26 + $0x30] sm:$0xff]  ;;  %s2125_s19 = sshll.u32 %s3852_s27, 2 }
  0xfb   : > { %2477 = vmatprep.subr.bf16.mxu0 %v2476_v13  ;;  %v3607_v52 = vpack.c.bf16 %v1073_v51, %v1072_v50  ;;  %v1075_v54 = vld [vmem:[%s3851_s26 + $0x38] sm:$0xff]  ;;  %p648_p1 = scmp.lt.s32.totalorder %s2125_s19, 7  ;;  %v1426_v51 = vld [vmem:[%s3502_s6 + $0x8] sm:$0xff] }
  0xfc   : > { %v3617_v55 = vpack.c.bf16 %v1075_v54, %v1074_v53  ;;  %v1425_v50 = vld [vmem:[%s3502_s6] sm:$0xff] }
  0xfd   : > { %s3882_s19 = smov (!%p648_p1, %s2125_s19), 7  ;;  %v2564_v54 = vpack.c.bf16 %v1426_v51, %v1425_v50 }
  0xfe   : > { %2479 = vmatpush3.bf16.msra.mxu0 %v2476_v13  ;;  %s2126_s13 = sshll.u32 %s3882_s19, 3 }
  0xff   : > { %2481 = vmatprep.subr.bf16.mxu0 %v2480_v17  ;;  %s651_s29 = scalar_lea.vmem %s3853_s30, %s2126_s13  ;;  %s644_s30 = scalar_lea.vmem [#allocation13], %s2124_s14 }
 0x100   : > { %s3072_s14 = smov [#allocation13]  }
 0x102   : > { %2483 = vmatpush3.bf16.msra.mxu0 %v2480_v17 }
 0x103   : > { %2485 = vmatprep.subr.bf16.mxu0 %v2484_v20 }
 0x106   : > { %2487 = vmatpush3.bf16.msra.mxu0 %v2484_v20 }
 0x109   : > { %2301 = vmatmul.mubr.msk.f32.vlgmr.msra.gmra.mrb[0].mxu0 %vm667_vm0, %v3542_v21 }
 0x10a   : > { %2303 = vmatprep.mubr.msk.f32.mxu0 %vm667_vm0, %v3545_v22 }
 0x10d   : > { %2304 = vmatmul.mubr.msk.f32.gmra.mrb[2].mxu0 %vm667_vm0, %v3552_v23 }
 0x10e   : > { %2347 = vmatprep.mubr.msk.f32.mxu0 %vm765_vm1, %v653_v24 }
 0x1dc   : > { %v2302_v25 = vpop.f32.mrb[0].mxu0 }
 0x1dd   : > { %v746_v26 = vpop.f32.mrb[1].mxu0 }
 0x1de   : > { %v2488_v27 = vpack.c.bf16 %v2302_v25, %v746_v26 }
 0x1e0   : > { %v2305_v28 = vpop.f32.mrb[2].mxu0  ;;  %2489 = vmatprep.subr.bf16.mxu1 %v2488_v27 }
 0x1e1   : > { %v756_v29 = vpop.f32.mrb[3].mxu0  ;;  %2491 = vmatpush3.bf16.msra.mxu1 %v2488_v27 }
 0x1e2   : > { %v2492_v30 = vpack.c.bf16 %v2305_v28, %v756_v29 }
 0x1e4   : > { %2493 = vmatprep.subr.bf16.mxu1 %v2492_v30 }
 0x1e5   : > { %2495 = vmatpush3.bf16.msra.mxu1 %v2492_v30 }
 0x1e6   : > { %2497 = vmatprep.subr.bf16.mxu1 %v2472_v11 }
 0x1e8   : > { %2315 = vmatmul.mubr.msk.f32.vlgmr.msra.gmra.mrb[0].mxu1 %vm765_vm1, %v654_v31 }
 0x1e9   : > { %2499 = vmatpush3.bf16.msra.mxu1 %v2472_v11  ;;  %2333 = vmatprep.mubr.msk.f32.mxu1 %vm667_vm0, %v3559_v32 }
 0x1ea   : > { %2501 = vmatprep.subr.bf16.mxu1 %v2476_v13 }
 0x1ed   : > { %2503 = vmatpush3.bf16.msra.mxu1 %v2476_v13 }
 0x1ee   : > { %2505 = vmatprep.subr.bf16.mxu1 %v2480_v17 }
 0x1f1   : > { %2507 = vmatpush3.bf16.msra.mxu1 %v2480_v17 }
 0x1f2   : > { %2509 = vmatprep.subr.bf16.mxu1 %v2484_v20 }
 0x1f5   : > { %2511 = vmatpush3.bf16.msra.mxu1 %v2484_v20 }
 0x1f6   : > { %2536 = vmatprep.subr.bf16.mxu1 %v3069_v56 }
 0x1f8   : > { %2334 = vmatmul.mubr.msk.f32.vlgmr.msra.gmra.mrb[2].mxu1 %vm667_vm0, %v3565_v33 }
 0x1f9   : > { %2336 = vmatprep.mubr.msk.f32.mxu1 %vm667_vm0, %v3568_v34 }
 0x1fc   : > { %2337 = vmatmul.mubr.msk.f32.gmra.mrb[4].mxu1 %vm667_vm0, %v3575_v35 }
 0x1fd   : > { %2380 = vmatprep.mubr.msk.f32.mxu1 %vm3070_vm2, %v3071_v57 }
 0x2bb   : > { %v2316_v36 = vpop.f32.mrb[0].mxu1 }
 0x2bc   : > { %v838_v37 = vpop.f32.mrb[1].mxu1  ;;  %v850_v61 = vsub.f32 %v848_v58, %v2316_v36  ;;  %v1428_v58 = vld [vmem:[%s3502_s6 + $0x18] sm:$0xff] }
 0x2bd   : > { %v849_v63 = vsub.f32 %v847_v59, %v838_v37  ;;  %v1067_v37 = vld [vmem:[#allocation9] sm:$0xff] }
 0x2be   : > { %v852_v4 = vmul.f32 %v850_v61, %v850_v61  ;;  %v2164_v61 = vld [vmem:[%s3502_s6 + $0x20] sm:$0xff] }
 0x2bf   : > { %v851_v6 = vmul.f32 %v849_v63, %v849_v63  ;;  %v2166_v63 = vld [vmem:[%s3502_s6 + $0x30] sm:$0xff] }
 0x2cb   : > { %v2335_v38 = vpop.f32.mrb[2].mxu1 }
 0x2cc   : > { %v936_v39 = vpop.f32.mrb[3].mxu1 }
 0x2cd   : > { %v2512_v40 = vpack.c.bf16 %v2335_v38, %v936_v39 }
 0x2cf   : > { %v2338_v43 = vpop.f32.mrb[4].mxu1  ;;  %2513 = vmatprep.subr.bf16.mxu0 %v2512_v40 }
 0x2d0   : > { %v946_v44 = vpop.f32.mrb[5].mxu1  ;;  %2515 = vmatpush3.bf16.msra.mxu0 %v2512_v40 }
 0x2d1   : > { %v2516_v45 = vpack.c.bf16 %v2338_v43, %v946_v44 }
 0x2d3   : > { %2517 = vmatprep.subr.bf16.mxu0 %v2516_v45 }
 0x2d4   : > { %2519 = vmatpush3.bf16.msra.mxu0 %v2516_v45 }
 0x2d5   : > { %2521 = vmatprep.subr.bf16.mxu0 %v3585_v46 }
 0x2d7   : > { %2348 = vmatmul.mubr.msk.f32.vlgmr.msra.gmra.mrb[4].mxu0 %vm765_vm1, %v654_v31 }
 0x2d8   : > { %2523 = vmatpush3.bf16.msra.mxu0 %v3585_v46  ;;  %2366 = vmatprep.mubr.msk.f32.mxu0 %vm667_vm0, %v3531_v16 }
 0x2d9   : > { %2525 = vmatprep.subr.bf16.mxu0 %v3594_v49 }
 0x2dc   : > { %2527 = vmatpush3.bf16.msra.mxu0 %v3594_v49 }
 0x2dd   : > { %2529 = vmatprep.subr.bf16.mxu0 %v3607_v52 }
 0x2e0   : > { %2531 = vmatpush3.bf16.msra.mxu0 %v3607_v52 }
 0x2e1   : > { %2533 = vmatprep.subr.bf16.mxu0 %v3617_v55 }
 0x2e4   : > { %2535 = vmatpush3.bf16.msra.mxu0 %v3617_v55 }
 0x2e5   : > { %2558 = vmatprep.subr.bf16.mxu0 %v3069_v56 }
 0x2e7   : > { %2367 = vmatmul.mubr.msk.f32.vlgmr.msra.gmra.mrb[6].mxu0 %vm667_vm0, %v3542_v21 }
 0x2e8   : > { %2369 = vmatprep.mubr.msk.f32.mxu0 %vm667_vm0, %v3545_v22 }
 0x2eb   : > { %2370 = vmatmul.mubr.msk.f32.gmra.mrb[8].mxu0 %vm667_vm0, %v3552_v23 }
 0x2ec   : > { %2413 = vmatprep.mubr.msk.f32.mxu0 %vm3070_vm2, %v3071_v57  ;;  %v1427_v57 = vld [vmem:[%s3502_s6 + $0x10] sm:$0xff] }
 0x2ed   : > { %v2568_v59 = vpack.c.bf16 %v1428_v58, %v1427_v57 }
 0x3aa   : > { %v2349_v0 = vpop.f32.mrb[4].mxu0 }
 0x3ab   : > { %v1034_v1 = vsub.f32 %v2144_v60, %v2349_v0  ;;  %v1021_v2 = vpop.f32.mrb[5].mxu0  ;;  %v1417_v60 = vld [vmem:[%s651_s29] sm:$0xff]  ;;  %v2167_v0 = vld [vmem:[%s3502_s6 + $0x38] sm:$0xff] }
 0x3ac   : > { %v1033_v3 = vsub.f32 %v2143_v62, %v1021_v2  ;;  %v2165_v62 = vld [vmem:[%s3502_s6 + $0x28] sm:$0xff]  ;;  %v1419_v2 = vld [vmem:[%s651_s29 + $0x10] sm:$0xff] }
 0x3ad   : > { %v1036_v5 = vmul.f32 %v1034_v1, %v1034_v1  ;;  %v1418_v1 = vld [vmem:[%s651_s29 + $0x8] sm:$0xff] }
 0x3ae   : > { %v1035_v7 = vmul.f32 %v1033_v3, %v1033_v3  ;;  %v2584_v3 = vpack.c.bf16 %v2167_v0, %v2166_v63 }
 0x3af   : > { %v1038_v8 = vadd.f32 %v1036_v5, %v852_v4  ;;  %v1420_v4 = vld [vmem:[%s651_s29 + $0x18] sm:$0xff]  ;;  %s1901_s29 = sshll.u32 %s644_s30, 4  ;;  %s3706_s29 = int_to_ptr.vmem [resolvable:$true] %s1901_s29 }
 0x3b0   : > { %v1037_v9 = vadd.f32 %v1035_v7, %v851_v6  ;;  %v1421_v5 = vld [vmem:[#allocation12] sm:$0xff]  ;;  %v1422_v6 = vld [vmem:[#allocation12 + $0x8] sm:$0xff] }
 0x3b1   : > { %2755 = vrsqrt.f32 %v1038_v8  ;;  %vm1048_vm3 = vcmp.eq.f32.partialorder %v1038_v8, inf  ;;  %v1051_v18 = vand.u32 2147483648, %v1038_v8  ;;  %vm1050_vm5 = vcmp.eq.f32.partialorder %v1038_v8, 0.0 }
 0x3b2   : > { %2757 = vrsqrt.f32 %v1037_v9  ;;  %vm1041_vm4 = vcmp.eq.f32.partialorder %v1037_v9, inf  ;;  %v1044_v20 = vand.u32 2147483648, %v1037_v9  ;;  %vm1043_vm6 = vcmp.eq.f32.partialorder %v1037_v9, 0.0 }
 0x3b3   : > { %v2572_v7 = vpack.c.bf16 %v1422_v6, %v1421_v5 }
 0x3ba   : > { %v2368_v10 = vpop.f32.mrb[6].mxu0 }
 0x3bb   : > { %v2756_v11 = vpop.eup %2755  ;;  %v1142_v12 = vpop.f32.mrb[7].mxu0 }
 0x3bc   : > { %v2758_v13 = vpop.eup %2757  ;;  %v2537_v14 = vpack.c.bf16 %v2368_v10, %v1142_v12  ;;  %v1047_v15 = vmul.f32 %v2756_v11, %v1038_v8  ;;  %v1234_v11 = vld [vmem:[%s3491_s3] sm:$0xff]  ;;  %v2155_v12 = vld [vmem:[%s3491_s3 + $0x8] sm:$0xff]  ;;  %s3854_s3 = sld [smem:[#allocation28_spill]] }
 0x3bd   : > { %v1040_v17 = vmul.f32 %v2758_v13, %v1037_v9 }
 0x3be   : > { %v2371_v19 = vpop.f32.mrb[8].mxu0  ;;  %2538 = vmatpush3.bf16.msra.mxu1 %v2537_v14  ;;  %v1049_v24 = vsel %vm1048_vm3, %v1038_v8, %v1047_v15  ;;  %v1423_v8 = vld [vmem:[#allocation12 + $0x10] sm:$0xff] }
 0x3bf   : > { %v1152_v25 = vpop.f32.mrb[9].mxu0  ;;  %2539 = vmatprep.subr.bf16.mxu1 %v3069_v56  ;;  %v1042_v26 = vsel %vm1041_vm4, %v1037_v9, %v1040_v17  ;;  %v1052_v27 = vsel %vm1050_vm5, %v1051_v18, %v1049_v24  ;;  %v1424_v9 = vld [vmem:[#allocation12 + $0x18] sm:$0xff] }
 0x3c0   : > { %v2540_v28 = vpack.c.bf16 %v2371_v19, %v1152_v25  ;;  %v1045_v29 = vsel %vm1043_vm6, %v1044_v20, %v1042_v26  ;;  %v1054_v30 = vsel %vm765_vm1, %v1052_v27, 0.0  ;;  %v2576_v10 = vpack.c.bf16 %v1424_v9, %v1423_v8 }
 0x3c1   : > { %v1053_v31 = vsel %vm765_vm1, %v1045_v29, 0.0 }
 0x3c2   : > { %2541 = vmatpush3.bf16.msra.mxu1 %v2540_v28  ;;  %v1055_v36 = vadd.f32 %v1054_v30, %v1053_v31  ;;  %s2177_s10 = sshll.u32 %s3854_s3, 1  ;;  %s3856_s3 = sld [smem:[#allocation41_spill]] }
 0x3c3   : > { %2543 = vmatprep.subr.bf16.mxu1 %v3585_v46  ;;  %s1897_s17 = sadd.s32 %s3852_s27, %s2177_s10  ;;  %s1886_s27 = scalar_lea.sflag [#allocation5], %s3473_s24 }
 0x3c4   : > { %1056 = vadd.xlane.f32.xlu0 %v1055_v36  ;;  %s2178_s8 = sshll.u32 %s1897_s17, 7  ;;  %s2913_s10 = sshll.u32 %s3072_s14, 4  ;;  %s2914_s10 = int_to_ptr.vmem [resolvable:$false] %s2913_s10 }
 0x3c5   : > { %2381 = vmatmul.mubr.msk.f32.vlgmr.msra.gmra.mrb[6].mxu1 %vm765_vm1, %v1067_v37  ;;  %p2916_p8 = scmp.lt.s32.totalorder %s3706_s29, %s2914_s10 }
 0x3c6   : > { %2545 = vmatpush3.bf16.msra.mxu1 %v3585_v46  ;;  %2399 = vmatprep.mubr.msk.f32.mxu1 %vm667_vm0, %v3559_v32 }
 0x3c7   : > { %2547 = vmatprep.subr.bf16.mxu1 %v3594_v49 }
 0x3ca   : > { %2549 = vmatpush3.bf16.msra.mxu1 %v3594_v49 }
 0x3cb   : > { %2551 = vmatprep.subr.bf16.mxu1 %v3607_v52 }
 0x3ce   : > { %2553 = vmatpush3.bf16.msra.mxu1 %v3607_v52 }
 0x3cf   : > { %2555 = vmatprep.subr.bf16.mxu1 %v3617_v55 }
 0x3d2   : > { %2557 = vmatpush3.bf16.msra.mxu1 %v3617_v55 }
 0x3d3   : > { %2573 = vmatprep.subr.bf16.mxu1 %v2572_v7 }
 0x3d5   : > { %2400 = vmatmul.mubr.msk.f32.vlgmr.msra.gmra.mrb[8].mxu1 %vm667_vm0, %v3565_v33 }
 0x3d6   : > { %2402 = vmatprep.mubr.msk.f32.mxu1 %vm667_vm0, %v3568_v34  ;;  %2575 = vmatpush3.bf16.msra.mxu1 %v2572_v7 }
 0x3d7   : > { %2577 = vmatprep.subr.bf16.mxu1 %v2576_v10 }
 0x3d9   : > { %2403 = vmatmul.mubr.msk.f32.gmra.mrb[10].mxu1 %vm667_vm0, %v3575_v35 }
 0x3da   : > { %2579 = vmatpush3.bf16.msra.mxu1 %v2576_v10 }
 0x3db   : > { %2589 = vmatprep.subr.bf16.mxu1 %v2572_v7 }
 0x451   : > { %v1057_v38 = vpop.xlane.xlu0 %1056 }
 0x452   : > { %v1058_v39 = vrot.slane %v1057_v38, 4 }
 0x454   : > { %v1059_v40 = vadd.f32 %v1058_v39, %v1057_v38 }
 0x456   : > { %v1060_v41 = vrot.slane %v1059_v40, 2 }
 0x458   : > { %v1061_v42 = vadd.f32 %v1060_v41, %v1059_v40 }
 0x45a   : > { %v1062_v43 = vrot.slane %v1061_v42, 1 }
 0x45c   : > { %v1063_v44 = vadd.f32 %v1062_v43, %v1061_v42 }
 0x45e   : > { %2596 = vpush %v1063_v44 }
 0x48f   : > { %s2597_s6 = spop %2596 }
 0x490   : > { %s1065_s20 = smul.f32 2.4414062e-06, %s2597_s6 }
 0x498   : > { %v1230_v45 = vpop.f32.mrb[6].mxu1 }
 0x499   : > { %v2382_v46 = vpop.f32.mrb[7].mxu1  ;;  %v1235_v13 = vsub.f32 %v1234_v11, %v1230_v45 }
 0x49b   : > { %v1236_v18 = vmul.f32 %v1235_v13, %v1235_v13 }
 0x4a8   : > { %v2401_v47 = vpop.f32.mrb[8].mxu1 }
 0x4a9   : > { %v1303_v48 = vpop.f32.mrb[9].mxu1 }
 0x4aa   : > { %v2559_v49 = vpack.c.bf16 %v2401_v47, %v1303_v48 }
 0x4ac   : > { %v2404_v52 = vpop.f32.mrb[10].mxu1  ;;  %2560 = vmatpush3.bf16.msra.mxu0 %v2559_v49 }
 0x4ad   : > { %v1313_v53 = vpop.f32.mrb[11].mxu1  ;;  %2561 = vmatprep.subr.bf16.mxu0 %v3069_v56  ;;  %v2580_v56 = vpack.c.bf16 %v2165_v62, %v2164_v61 }
 0x4ae   : > { %v2562_v55 = vpack.c.bf16 %v2404_v52, %v1313_v53 }
 0x4b0   : > { %2563 = vmatpush3.bf16.msra.mxu0 %v2562_v55 }
 0x4b1   : > { %2565 = vmatprep.subr.bf16.mxu0 %v2564_v54 }
 0x4b3   : > { %2414 = vmatmul.mubr.msk.f32.vlgmr.msra.gmra.mrb[10].mxu0 %vm765_vm1, %v1067_v37 }
 0x4b4   : > { %2567 = vmatpush3.bf16.msra.mxu0 %v2564_v54  ;;  %2424 = vmatprep.mubr.msk.f32.mxu0 %vm765_vm1, %v1417_v60 }
 0x4b5   : > { %2569 = vmatprep.subr.bf16.mxu0 %v2568_v59 }
 0x4b8   : > { %2571 = vmatpush3.bf16.msra.mxu0 %v2568_v59 }
 0x4b9   : > { %2581 = vmatprep.subr.bf16.mxu0 %v2580_v56 }
 0x4bb   : > { %2425 = vmatmul.mubr.msk.f32.vlgmr.msra.gmra.mrb[12].mxu0 %vm765_vm1, %v1418_v1 }
 0x4bc   : > { %2583 = vmatpush3.bf16.msra.mxu0 %v2580_v56  ;;  %2427 = vmatprep.mubr.msk.f32.mxu0 %vm765_vm1, %v1419_v2 }
 0x4bd   : > { %2585 = vmatprep.subr.bf16.mxu0 %v2584_v3 }
 0x4bf   : > { %2428 = vmatmul.mubr.msk.f32.gmra.mrb[14].mxu0 %vm765_vm1, %v1420_v4 }
 0x4c0   : > { %2587 = vmatpush3.bf16.msra.mxu0 %v2584_v3  ;;  %2452 = vmatprep.mubr.msk.f32.mxu0 %vm765_vm1, %v1417_v60 }
 0x4c3   : > { %2453 = vmatmul.mubr.msk.f32.vlgmr.msra.gmra.mrb[16].mxu0 %vm765_vm1, %v1418_v1 }
 0x4c4   : > { %2455 = vmatprep.mubr.msk.f32.mxu0 %vm765_vm1, %v1419_v2 }
 0x4c7   : > { %2456 = vmatmul.mubr.msk.f32.gmra.mrb[18].mxu0 %vm765_vm1, %v1420_v4 }
 0x586   : > { %v1388_v14 = vpop.f32.mrb[10].mxu0 }
 0x587   : > { %v1394_v15 = vsub.f32 %v2155_v12, %v1388_v14  ;;  %v2415_v17 = vpop.f32.mrb[11].mxu0 }
 0x589   : > { %v1395_v19 = vmul.f32 %v1394_v15, %v1394_v15 }
 0x58b   : > { %v1396_v20 = vadd.f32 %v1395_v19, %v1236_v18 }
 0x58d   : > { %2759 = vrsqrt.f32 %v1396_v20  ;;  %vm1399_vm7 = vcmp.eq.f32.partialorder %v1396_v20, inf  ;;  %v1402_v36 = vand.u32 2147483648, %v1396_v20  ;;  %vm1401_vm9 = vcmp.eq.f32.partialorder %v1396_v20, 0.0 }
 0x58e   : > { %v2426_v24 = vpop.f32.mrb[12].mxu0 }
 0x58f   : > { %v1507_v25 = vpop.f32.mrb[13].mxu0 }
 0x590   : > { %2438 = vmatprep.mubr.msk.f32.mxu1 %vm765_vm1, %v1507_v25 }
 0x591   : > { %2439 = vmatmul.mubr.msk.f32.vlgmr.msra.gmra.mrb[12].mxu1 %vm765_vm1, %v2426_v24 }
 0x592   : > { %v2429_v26 = vpop.f32.mrb[14].mxu0  ;;  %2591 = vmatpush3.bf16.msra.mxu1 %v2572_v7 }
 0x593   : > { %v1517_v27 = vpop.f32.mrb[15].mxu0  ;;  %2593 = vmatprep.subr.bf16.mxu1 %v2576_v10 }
 0x594   : > { %2441 = vmatprep.mubr.msk.f32.mxu1 %vm765_vm1, %v1517_v27 }
 0x595   : > { %2442 = vmatmul.mubr.msk.f32.gmra.mrb[14].mxu1 %vm765_vm1, %v2429_v26 }
 0x596   : > { %v2454_v28 = vpop.f32.mrb[16].mxu0  ;;  %2595 = vmatpush3.bf16.msra.mxu1 %v2576_v10 }
 0x597   : > { %v2760_v29 = vpop.eup %2759  ;;  %v1702_v30 = vpop.f32.mrb[17].mxu0 }
 0x598   : > { %2466 = vmatprep.mubr.msk.f32.mxu1 %vm765_vm1, %v1702_v30  ;;  %v1398_v31 = vmul.f32 %v2760_v29, %v1396_v20 }
 0x599   : > { %2467 = vmatmul.mubr.msk.f32.vlgmr.msra.gmra.mrb[16].mxu1 %vm765_vm1, %v2454_v28 }
 0x59a   : > { %v2457_v37 = vpop.f32.mrb[18].mxu0  ;;  %v1400_v38 = vsel %vm1399_vm7, %v1396_v20, %v1398_v31 }
 0x59b   : > { %v1712_v39 = vpop.f32.mrb[19].mxu0  ;;  %v1403_v40 = vsel %vm1401_vm9, %v1402_v36, %v1400_v38 }
 0x59c   : > { %2469 = vmatprep.mubr.msk.f32.mxu1 %vm765_vm1, %v1712_v39  ;;  %v1405_v41 = vsel %vm1404_vm8, %v1403_v40, 0.0 }
 0x59d   : > { %2470 = vmatmul.mubr.msk.f32.gmra.mrb[18].mxu1 %vm765_vm1, %v2457_v37  ;;  %1406 = vadd.xlane.f32.xlu0 %v1405_v41 }
 0x62a   : > { %v1407_v42 = vpop.xlane.xlu0 %1406 }
 0x62b   : > { %v1408_v43 = vrot.slane %v1407_v42, 4 }
 0x62d   : > { %v1409_v44 = vadd.f32 %v1408_v43, %v1407_v42 }
 0x62f   : > { %v1410_v45 = vrot.slane %v1409_v44, 2 }
 0x631   : > { %v1411_v46 = vadd.f32 %v1410_v45, %v1409_v44 }
 0x633   : > { %v1412_v47 = vrot.slane %v1411_v46, 1 }
 0x635   : > { %v1413_v48 = vadd.f32 %v1412_v47, %v1411_v46  ;;  %v1875_v47 = vlaneseq }
 0x637   : > { %2598 = vpush %v1413_v48  ;;  %v1876_v48 = vshrl.u32 %v1875_v47, 7 }
 0x639   : > { %vm1880_vm3 = vcmp.eq.s32.totalorder %v1876_v48, 1 }
 0x664   : > { %v2440_v49 = vpop.f32.mrb[12].mxu1 }
 0x665   : > { %v1604_v50 = vpop.f32.mrb[13].mxu1  ;;  %v1624_v53 = vsub.f32 %v3542_v21, %v2440_v49 }
 0x666   : > { %v1623_v54 = vsub.f32 %v3531_v16, %v1604_v50 }
 0x667   : > { %v1628_v60 = vmul.f32 %v1624_v53, %v1624_v53 }
 0x668   : > { %v2443_v51 = vpop.f32.mrb[14].mxu1  ;;  %v1627_v56 = vmul.f32 %v1623_v54, %v1623_v54  ;;  %s2599_s12 = spop %2598 }
 0x669   : > { %v1614_v52 = vpop.f32.mrb[15].mxu1  ;;  %v1626_v61 = vsub.f32 %v3552_v23, %v2443_v51  ;;  %s1415_s28 = smul.f32 1.953125e-05, %s2599_s12 }
 0x66a   : > { %v1625_v63 = vsub.f32 %v3545_v22, %v1614_v52 }
 0x66b   : > { %s1416_s16 = sadd.f32 %s1415_s28, %s1065_s20  ;;  %s3704_s28 = scalar_lea.hbm %s3856_s3, %s2178_s8 }
 0x66c   : > { %v2468_v55 = vpop.f32.mrb[16].mxu1  ;;  %s2909_s20 = scalar_lea.vmem %s3706_s29, 128 }
 0x66d   : > { %v1819_v57 = vsub.f32 %v3565_v33, %v2468_v55  ;;  %v1799_v58 = vpop.f32.mrb[17].mxu1  ;;  %v1630_v33 = vmul.f32 %v1626_v61, %v1626_v61  ;;  %v1878_v49 = vstv %s1416_s16  ;;  %p2910_p4 = scmp.ne.s32.totalorder %s3706_s29, %s2909_s20  ;;  %s2915_s16 = scalar_lea.vmem %s2914_s10, 256 }
 0x66e   : > { %v1818_v59 = vsub.f32 %v3559_v32, %v1799_v58  ;;  %v1629_v32 = vmul.f32 %v1625_v63, %v1625_v63  ;;  %p2917_p13 = scmp.lt.s32.totalorder %s2915_s16, %s2909_s20 }
 0x66f   : > { %v1823_v62 = vmul.f32 %v1819_v57, %v1819_v57  ;;  %p2911_p2 = pnand %p2910_p4, %p3857_p3 }
 0x670   : > { %v1822_v0 = vmul.f32 %v1818_v59, %v1818_v59  ;;  %v2471_v1 = vpop.f32.mrb[18].mxu1  ;;  %p2918_p5 = por %p2917_p13, %p2916_p8 }
 0x671   : > { %v1827_v2 = vadd.f32 %v1823_v62, %v1628_v60  ;;  %v1821_v21 = vsub.f32 %v3575_v35, %v2471_v1  ;;  %v1809_v3 = vpop.f32.mrb[19].mxu1  ;;  %p2912_p9 = pneg %p2911_p2 }
 0x672   : > { %v1826_v16 = vadd.f32 %v1822_v0, %v1627_v56  ;;  %v1820_v4 = vsub.f32 %v3568_v34, %v1809_v3 }
 0x673   : > { %2761 = vrsqrt.f32 %v1827_v2  ;;  %v1825_v5 = vmul.f32 %v1821_v21, %v1821_v21  ;;  %vm1839_vm10 = vcmp.eq.f32.partialorder %v1827_v2, inf  ;;  %v1842_v35 = vand.u32 2147483648, %v1827_v2  ;;  %p2919_p0 = pnand %p2918_p5, %p2912_p9 }
 0x674   : > { %2763 = vrsqrt.f32 %v1826_v16  ;;  %v1824_v6 = vmul.f32 %v1820_v4, %v1820_v4  ;;  %vm1832_vm11 = vcmp.eq.f32.partialorder %v1826_v16, inf  ;;  %v1835_v11 = vand.u32 2147483648, %v1826_v16 }
 0x675   : > { %v1829_v23 = vadd.f32 %v1825_v5, %v1630_v33  ;;  %vm1841_vm12 = vcmp.eq.f32.partialorder %v1827_v2, 0.0  ;;  %vm1834_vm13 = vcmp.eq.f32.partialorder %v1826_v16, 0.0 }
 0x676   : > { %v1828_v7 = vadd.f32 %v1824_v6, %v1629_v32 }
 0x677   : > { %2765 = vrsqrt.f32 %v1829_v23  ;;  %vm1853_vm14 = vcmp.eq.f32.partialorder %v1829_v23, inf  ;;  %v1856_v24 = vand.u32 2147483648, %v1829_v23  ;;  %vm1855_vm2 = vcmp.eq.f32.partialorder %v1829_v23, 0.0 }
 0x678   : > { %2767 = vrsqrt.f32 %v1828_v7  ;;  %vm1846_vm15 = vcmp.eq.f32.partialorder %v1828_v7, inf  ;;  %v1849_v26 = vand.u32 2147483648, %v1828_v7  ;;  %vm1848_vm1 = vcmp.eq.f32.partialorder %v1828_v7, 0.0 }
 0x67d   : > { %v2762_v22 = vpop.eup %2761 }
 0x67e   : > { %v2764_v8 = vpop.eup %2763  ;;  %v1838_v9 = vmul.f32 %v2762_v22, %v1827_v2 }
 0x67f   : > { %v1831_v10 = vmul.f32 %v2764_v8, %v1826_v16 }
 0x680   : > { %v1840_v12 = vsel %vm1839_vm10, %v1827_v2, %v1838_v9 }
 0x681   : > { %v2766_v34 = vpop.eup %2765  ;;  %v1833_v13 = vsel %vm1832_vm11, %v1826_v16, %v1831_v10  ;;  %v1843_v14 = vsel %vm1841_vm12, %v1842_v35, %v1840_v12 }
 0x682   : > { %v2768_v15 = vpop.eup %2767  ;;  %v1836_v17 = vsel %vm1834_vm13, %v1835_v11, %v1833_v13  ;;  %v1852_v18 = vmul.f32 %v2766_v34, %v1829_v23  ;;  %v1859_v19 = vsel %vm667_vm0, %v1843_v14, 0.0 }
 0x683   : > { %v1845_v20 = vmul.f32 %v2768_v15, %v1828_v7  ;;  %v1858_v25 = vsel %vm667_vm0, %v1836_v17, 0.0 }
 0x684   : > { %v1854_v27 = vsel %vm1853_vm14, %v1829_v23, %v1852_v18  ;;  %v1860_v28 = vadd.f32 %v1859_v19, %v1858_v25 }
 0x685   : > { %v1847_v29 = vsel %vm1846_vm15, %v1828_v7, %v1845_v20  ;;  %v1857_v31 = vsel %vm1855_vm2, %v1856_v24, %v1854_v27 }
 0x686   : > { %v1850_v30 = vsel %vm1848_vm1, %v1849_v26, %v1847_v29  ;;  %v1863_v38 = vsel %vm667_vm0, %v1857_v31, 0.0 }
 0x687   : > { %v1861_v36 = vsel %vm667_vm0, %v1850_v30, 0.0  ;;  %vm1877_vm0 = vcmp.eq.s32.totalorder %v1876_v48, 0 }
 0x688   : > { %v1862_v37 = vadd.f32 %v1861_v36, %v1860_v28  ;;  %v1879_v51 = vsel %vm1877_vm0, %v1878_v49, 0.0 }
 0x68a   : > { %v1864_v39 = vadd.f32 %v1863_v38, %v1862_v37 }
 0x68c   : > { %1865 = vadd.xlane.f32.xlu1 %v1864_v39 }
 0x719   : > { %v1866_v40 = vpop.xlane.xlu1 %1865 }
 0x71a   : > { %v1867_v41 = vrot.slane %v1866_v40, 4 }
 0x71c   : > { %v1868_v42 = vadd.f32 %v1867_v41, %v1866_v40 }
 0x71e   : > { %v1869_v43 = vrot.slane %v1868_v42, 2 }
 0x720   : > { %v1870_v44 = vadd.f32 %v1869_v43, %v1868_v42 }
 0x722   : > { %v1871_v45 = vrot.slane %v1870_v44, 1 }
 0x724   : > { %v1872_v46 = vadd.f32 %v1871_v45, %v1870_v44 }
 0x726   : > { %2600 = vpush %v1872_v46 }
 0x757   : > { %s2601_s19 = spop %2600 }
 0x758   : > { %s1874_s13 = smul.f32 0.00012207031, %s2601_s19 }
 0x75a   : > { %v1881_v50 = vstv %s1874_s13 }
 0x75b   : > { %v1882_v52 = vsel %vm1880_vm3, %v1881_v50, 0.0 }
 0x75c   : > { %v1883_v53 = vadd.f32 %v1882_v52, %v1879_v51 }
 0x75e   : > { %1884 = vst [vmem:[%s644_s30] sm:$0xff] %v1883_v53 }
 0x75f   : > { %2922 = shalt.err (!%p2919_p0)
}
 0x760   : > { %s2923_s24 = scalar_lea.hbm %s3704_s28, 128  ;;  %s2927_s13 = scalar_lea.hbm %s3856_s3, 512 }
 0x761   : > { %p2924_p6 = scmp.ne.s32.totalorder %s3704_s28, %s2923_s24  ;;  %p2928_p11 = scmp.lt.u32.totalorder %s3704_s28, %s3856_s3 }
 0x762   : > { %p2929_p10 = scmp.lt.u32.totalorder %s2927_s13, %s2923_s24  ;;  %p2931_p4 = scmp.lt.u32.totalorder %s2923_s24, %s3704_s28 }
 0x763   : > { %p2925_p7 = pnand %p2924_p6, %p3857_p3 }
 0x764   : > { %p2930_p1 = por %p2929_p10, %p2928_p11 }
 0x765   : > { %p2926_p12 = pneg %p2925_p7 }
 0x766   : > { %p2932_p2 = por %p2931_p4, %p2930_p1 }
 0x768   : > { %p2933_p9 = pnand %p2932_p2, %p2926_p12 }
 0x76a   : > { %2936 = shalt.err (!%p2933_p9)
}
 0x76b   : > { %2627 = dma.vmem_to_hbm [thread:$0]  (%p3857_p3), %s3706_s29, 128, %s3704_s28, %s1886_s27  }
 0x76c PF: > { %s3858_s6 = sld [smem:[#allocation25_spill]]  ;;  %s3859_s12 = sld [smem:[#allocation37_spill]] }
 0x76d   : > { %p2649_p8 = scmp.ge.s32.totalorder %s3051_s23, 2 }
 0x772   : > { %s1913_s20 = sand.u32 1, %s3858_s6   ;;  %p3860_p13 = scmp.ne.s32.totalorder %s3859_s12, 0 }
 0x773   : > { %s1914_s14 = scalar_lea.sflag [#allocation5], %s1913_s20 }
 0x774   : > { %p2640_p5 = pnand %p2649_p8, %p3860_p13 }
 0x776   : > { %3006 = dma.done.wait (!%p2640_p5), %s1914_s14, 128  }
 0x777   : > { %3008 = vsyncadd (!%p2640_p5), %s1914_s14, 4294967168  ;;  %s30_s23 = sadd.s32 1, %s3051_s23   ;;  %s3861_s13 = sld [smem:[#allocation24_spill]] }
 0x778   : > { %p27_p0 = scmp.ge.s32.totalorder %s30_s23, 6   ;;  %s3862_s11 = sld [smem:[#allocation33_spill]] }
 0x779   : > { %s3863_s16 = sld [smem:[#allocation26_spill]]  ;;  %s3864_s29 = sld [smem:[#allocation34_spill]] }
 0x77a   : > { %s3865_s28 = sld [smem:[#allocation30_spill]]  ;;  %s3866_s27 = sld [smem:[#allocation31_spill]] }
 0x77b   : > { %s3867_s14 = smov %s3019_s15  ;;  %s3869_s17 = smov %s3031_s18 }
 0x77c   : > { %s3871_s19 = smov %s3043_s21  ;;  %s3872_s20 = smov %s3047_s22 }
 0x77d   :  { %29 = sbr.rel (!%p27_p0) target bundleno = 17 (0x11), region = 199 }
 0x77e   : > { %s3868_s15 = smov %s3862_s11 }
 0x77f   : > { %s3870_s18 = smov %s3864_s29 }
 0x780   : > { %s3873_s21 = smov %s3865_s28  ;;  %s3874_s22 = smov %s3866_s27 }
 0x784   :  { %1919 = vsyncpa [#allocation4], 1 }
 0x785   :  { %1921 = vsyncpa [#allocation4 + $0x1], 1 }
 0x786   :  { %1922 = vsyncpa [#allocation7], 1 }
 0x787   :  { %1923 = vsyncpa [#allocation11], 1 }
 0x788   :  { %1925 = vsyncpa [#allocation11 + $0x1], 1 }
 0x789   :  { %1926 = vsyncpa [#allocation5], 1 }
 0x78a   :  { %1928 = vsyncpa [#allocation5 + $0x1], 1 }

</bundles_post_ra>
